<compile_context>
chip_gen: v7x
topology: tpu7x:2x2x1
jax: 0.10.0
libtpu: 0.0.40
codegen_flags: <defaults>
</compile_context>

<pallas_src>
from functools import partial

import jax
import jax.numpy as jnp
from jax.experimental import pallas as pl
from jax.experimental.pallas import tpu as pltpu


def stem_kernel(patches_ref, w_ref, gamma_ref, beta_ref, o_ref, *,
                num_groups, eps, OH, OW, PH):
    # patches_ref: (1, OH*OW, Kp) im2col patches for one sample
    # w_ref:       (Kp, C) conv weights (zero-padded along K)
    # gamma_ref, beta_ref: (1, C)
    # o_ref: (1, PH, OW, C) row-pooled + column-window-maxed map (caller picks even cols)
    C = w_ref.shape[1]
    HW = OH * OW
    cpg = C // num_groups

    # ---- Conv2d(k7, s2, p3, bias=False) as a single MXU matmul ----
    y = jnp.dot(patches_ref[0], w_ref[...], preferred_element_type=jnp.float32)  # (HW, C)

    # ---- GroupNorm(num_groups, C) + ReLU: one reduction pass, full-width affine ----
    ch_sum = jnp.sum(y, axis=0, keepdims=True)        # (1, C)
    ch_sq = jnp.sum(y * y, axis=0, keepdims=True)     # (1, C)
    lane = jax.lax.broadcasted_iota(jnp.int32, (1, C), 1)
    denom = float(HW * cpg)
    mean_vec = jnp.zeros((1, C), jnp.float32)
    var_vec = jnp.zeros((1, C), jnp.float32)
    for g in range(num_groups):                       # static tiny loop (2 groups)
        gmask = jnp.logical_and(lane >= g * cpg, lane < (g + 1) * cpg)
        gmean = jnp.sum(jnp.where(gmask, ch_sum, 0.0)) / denom
        gvar = jnp.sum(jnp.where(gmask, ch_sq, 0.0)) / denom - gmean * gmean
        gvar = jnp.maximum(gvar, 0.0)                 # E[x^2]-E[x]^2 can round negative
        mean_vec = jnp.where(gmask, gmean, mean_vec)
        var_vec = jnp.where(gmask, gvar, var_vec)
    inv = jax.lax.rsqrt(var_vec + eps)                # (1, C)
    scale = inv * gamma_ref[...]
    shift = beta_ref[...] - mean_vec * scale
    y = jnp.maximum(y * scale + shift, 0.0)           # (HW, C): GN + ReLU, one pass

    # ---- MaxPool2d(k=3, s=2, p=1): rows via aligned slabs, 3-wide col window vectorized
    # y >= 0 after ReLU, so zero padding is equivalent to -inf padding.
    zrow = jnp.zeros((1, C), jnp.float32)
    slabs = []
    for p in range(PH):                               # static loop over pooled rows
        parts = []
        for dr in (-1, 0, 1):
            r = 2 * p + dr
            if 0 <= r < OH:
                parts.append(y[r * OW:(r + 1) * OW, :])   # (OW, C) aligned slab slice
        m = parts[0]
        for t in parts[1:]:
            m = jnp.maximum(m, t)                     # max over the (up to) 3 input rows
        left = jnp.concatenate([zrow, m[:OW - 1, :]], axis=0)   # col j-1 (zero padded)
        right = jnp.concatenate([m[1:, :], zrow], axis=0)       # col j+1 (zero padded)
        slabs.append(jnp.maximum(jnp.maximum(left, m), right))  # (OW, C)
    o_ref[0] = jnp.stack(slabs, axis=0)               # (PH, OW, C)


def resnet1_forward(x_nchw, conv_w, gn_gamma, gn_beta, *, num_groups=2, eps=1e-5):
    N, Cin, H, W = x_nchw.shape
    Cout, _, KH, KW = conv_w.shape
    stride, pad = 2, 3
    OH = (H + 2 * pad - KH) // stride + 1
    OW = (W + 2 * pad - KW) // stride + 1
    PH = (OH + 2 * 1 - 3) // 2 + 1
    PW = (OW + 2 * 1 - 3) // 2 + 1
    HW = OH * OW
    K = KH * KW * Cin
    Kp = int(pl.cdiv(K, 128)) * 128                   # pad contraction dim to lane tiles

    # TODO(synk): im2col patch extraction (and the final stride-2 column subsample /
    # NCHW transpose below) stay as cheap XLA glue; the rest runs in one fused kernel.
    x = jnp.transpose(x_nchw, (0, 2, 3, 1)).astype(jnp.float32)           # NHWC
    xp = jnp.pad(x, ((0, 0), (pad, pad), (pad, pad), (0, 0)))
    cols = []
    for kh in range(KH):
        for kw in range(KW):
            cols.append(xp[:, kh:kh + stride * (OH - 1) + 1:stride,
                           kw:kw + stride * (OW - 1) + 1:stride, :])
    patches = jnp.stack(cols, axis=3).reshape(N, HW, K)                   # (N, HW, 147)
    patches = jnp.pad(patches, ((0, 0), (0, 0), (0, Kp - K)))             # (N, HW, Kp)

    w_mat = jnp.transpose(conv_w, (2, 3, 1, 0)).reshape(K, Cout).astype(jnp.float32)
    w_mat = jnp.pad(w_mat, ((0, Kp - K), (0, 0)))                         # (Kp, Cout)

    kern = partial(stem_kernel, num_groups=num_groups, eps=eps, OH=OH, OW=OW, PH=PH)
    out = pl.pallas_call(
        kern,
        out_shape=jax.ShapeDtypeStruct((N, PH, OW, Cout), jnp.float32),
        grid=(N,),
        in_specs=[
            pl.BlockSpec((1, HW, Kp), lambda n: (n, 0, 0)),
            pl.BlockSpec((Kp, Cout), lambda n: (0, 0)),
            pl.BlockSpec((1, Cout), lambda n: (0, 0)),
            pl.BlockSpec((1, Cout), lambda n: (0, 0)),
        ],
        out_specs=pl.BlockSpec((1, PH, OW, Cout), lambda n: (n, 0, 0, 0)),
        compiler_params=pltpu.CompilerParams(dimension_semantics=("parallel",)),
    )(patches, w_mat, gn_gamma.reshape(1, Cout), gn_beta.reshape(1, Cout))

    pooled = out[:, :, :2 * PW:2, :]                  # pick even columns -> (N, PH, PW, C)
    return jnp.transpose(pooled, (0, 3, 1, 2))        # NHWC -> NCHW (N, C, PH, PW)


if __name__ == "__main__":
    key = jax.random.PRNGKey(0)
    k_w, k_x = jax.random.split(key)

    # Parameter init matching the module's __init__:
    # conv1: kaiming_normal_(mode='fan_out', nonlinearity='relu') -> std = sqrt(2/(64*7*7))
    fan_out = 64 * 7 * 7
    conv_w = jax.random.normal(k_w, (64, 3, 7, 7), jnp.float32) * jnp.sqrt(2.0 / fan_out)
    # GroupNorm(2, 64): weight=1, bias=0
    gn_gamma = jnp.ones((64,), jnp.float32)
    gn_beta = jnp.zeros((64,), jnp.float32)

    # CIFAR-10-like input, small batch
    x = jax.random.normal(k_x, (2, 3, 32, 32), jnp.float32)

    fwd = jax.jit(resnet1_forward)
    out = fwd(x, conv_w, gn_gamma, gn_beta)
    out = jax.block_until_ready(out)
    assert out.shape == (2, 64, 8, 8), out.shape
    print("KERNEL_OK")
</pallas_src>

<mosaic_0001>
module attributes {stable_mosaic.version = 11 : i64} {
  func.func @stem_kernel(%arg0: i32, %arg1: memref<1x256x256xf32, #tpu.memory_space<vmem>>, %arg2: memref<256x64xf32, #tpu.memory_space<vmem>>, %arg3: memref<1x64xf32, #tpu.memory_space<vmem>>, %arg4: memref<1x64xf32, #tpu.memory_space<vmem>>, %arg5: memref<1x8x16x64xf32, #tpu.memory_space<vmem>>) attributes {dimension_semantics = [#tpu.dimension_semantics<parallel>], iteration_bounds = array<i64: 2>, scalar_prefetch = 0 : i64, scratch_operands = 0 : i64, tpu.core_type = #tpu.core_type<tc>, window_params = [{transform_indices = @transform_0, window_bounds = array<i64: 1, 256, 256>}, {pipeline_mode = #tpu.pipeline_mode<synchronous>, transform_indices = @transform_1, window_bounds = array<i64: 256, 64>}, {pipeline_mode = #tpu.pipeline_mode<synchronous>, transform_indices = @transform_2, window_bounds = array<i64: 1, 64>}, {pipeline_mode = #tpu.pipeline_mode<synchronous>, transform_indices = @transform_3, window_bounds = array<i64: 1, 64>}, {transform_indices = @transform_4, window_bounds = array<i64: 1, 8, 16, 64>}]} {
    %c0 = arith.constant 0 : index
    %c0_0 = arith.constant 0 : index
    %c0_1 = arith.constant 0 : index
    %0 = vector.load %arg1[%c0, %c0_0, %c0_1] : memref<1x256x256xf32, #tpu.memory_space<vmem>>, vector<1x256x256xf32>
    %1 = vector.shape_cast %0 : vector<1x256x256xf32> to vector<256x256xf32>
    %c0_2 = arith.constant 0 : index
    %c0_3 = arith.constant 0 : index
    %2 = vector.load %arg2[%c0_2, %c0_3] : memref<256x64xf32, #tpu.memory_space<vmem>>, vector<256x64xf32>
    %cst = arith.constant dense<0.000000e+00> : vector<256x64xf32>
    %3 = tpu.matmul %1, %2, %cst {dimension_numbers = #tpu.dot_dimension_numbers<[1], [0], [0], [1], [0, 0, 1, 1], [], []>} : vector<256x256xf32>, vector<256x64xf32>, vector<256x64xf32> -> vector<256x64xf32>
    %cst_4 = arith.constant dense<0.000000e+00> : vector<64xf32>
    %4 = vector.multi_reduction <add>, %3, %cst_4 [0] : vector<256x64xf32> to vector<64xf32>
    %5 = vector.shape_cast %4 : vector<64xf32> to vector<1x64xf32>
    %6 = arith.mulf %3, %3 : vector<256x64xf32>
    %cst_5 = arith.constant dense<0.000000e+00> : vector<64xf32>
    %7 = vector.multi_reduction <add>, %6, %cst_5 [0] : vector<256x64xf32> to vector<64xf32>
    %8 = vector.shape_cast %7 : vector<64xf32> to vector<1x64xf32>
    %9 = tpu.iota {dimensions = array<i32: 1>} : vector<1x64xi32>
    %cst_6 = arith.constant 0.000000e+00 : f32
    %10 = vector.broadcast %cst_6 : f32 to vector<1x64xf32>
    %cst_7 = arith.constant 0.000000e+00 : f32
    %11 = vector.broadcast %cst_7 : f32 to vector<1x64xf32>
    %c0_i32 = arith.constant 0 : i32
    %12 = vector.broadcast %c0_i32 : i32 to vector<1x64xi32>
    %13 = arith.cmpi sge, %9, %12 : vector<1x64xi32>
    %c32_i32 = arith.constant 32 : i32
    %14 = vector.broadcast %c32_i32 : i32 to vector<1x64xi32>
    %15 = arith.cmpi slt, %9, %14 : vector<1x64xi32>
    %16 = arith.andi %13, %15 : vector<1x64xi1>
    %cst_8 = arith.constant 0.000000e+00 : f32
    %17 = vector.broadcast %cst_8 : f32 to vector<1x64xf32>
    %18 = arith.select %16, %5, %17 : vector<1x64xi1>, vector<1x64xf32>
    %19 = vector.shape_cast %18 : vector<1x64xf32> to vector<1x1x64xf32>
    %cst_9 = arith.constant dense<0.000000e+00> : vector<1xf32>
    %20 = vector.multi_reduction <add>, %19, %cst_9 [1, 2] : vector<1x1x64xf32> to vector<1xf32>
    %21 = vector.shape_cast %20 : vector<1xf32> to vector<1x1x1xf32>
    %22 = vector.extract %21[0, 0, 0] : f32 from vector<1x1x1xf32>
    %cst_10 = arith.constant 8.192000e+03 : f32
    %23 = arith.divf %22, %cst_10 : f32
    %cst_11 = arith.constant 0.000000e+00 : f32
    %24 = vector.broadcast %cst_11 : f32 to vector<1x64xf32>
    %25 = arith.select %16, %8, %24 : vector<1x64xi1>, vector<1x64xf32>
    %26 = vector.shape_cast %25 : vector<1x64xf32> to vector<1x1x64xf32>
    %cst_12 = arith.constant dense<0.000000e+00> : vector<1xf32>
    %27 = vector.multi_reduction <add>, %26, %cst_12 [1, 2] : vector<1x1x64xf32> to vector<1xf32>
    %28 = vector.shape_cast %27 : vector<1xf32> to vector<1x1x1xf32>
    %29 = vector.extract %28[0, 0, 0] : f32 from vector<1x1x1xf32>
    %cst_13 = arith.constant 8.192000e+03 : f32
    %30 = arith.divf %29, %cst_13 : f32
    %31 = arith.mulf %23, %23 : f32
    %32 = arith.subf %30, %31 : f32
    %cst_14 = arith.constant 0.000000e+00 : f32
    %33 = arith.maximumf %32, %cst_14 : f32
    %34 = vector.broadcast %23 : f32 to vector<1x64xf32>
    %35 = arith.select %16, %34, %10 : vector<1x64xi1>, vector<1x64xf32>
    %36 = vector.broadcast %33 : f32 to vector<1x64xf32>
    %37 = arith.select %16, %36, %11 : vector<1x64xi1>, vector<1x64xf32>
    %c32_i32_15 = arith.constant 32 : i32
    %38 = vector.broadcast %c32_i32_15 : i32 to vector<1x64xi32>
    %39 = arith.cmpi sge, %9, %38 : vector<1x64xi32>
    %c64_i32 = arith.constant 64 : i32
    %40 = vector.broadcast %c64_i32 : i32 to vector<1x64xi32>
    %41 = arith.cmpi slt, %9, %40 : vector<1x64xi32>
    %42 = arith.andi %39, %41 : vector<1x64xi1>
    %cst_16 = arith.constant 0.000000e+00 : f32
    %43 = vector.broadcast %cst_16 : f32 to vector<1x64xf32>
    %44 = arith.select %42, %5, %43 : vector<1x64xi1>, vector<1x64xf32>
    %45 = vector.shape_cast %44 : vector<1x64xf32> to vector<1x1x64xf32>
    %cst_17 = arith.constant dense<0.000000e+00> : vector<1xf32>
    %46 = vector.multi_reduction <add>, %45, %cst_17 [1, 2] : vector<1x1x64xf32> to vector<1xf32>
    %47 = vector.shape_cast %46 : vector<1xf32> to vector<1x1x1xf32>
    %48 = vector.extract %47[0, 0, 0] : f32 from vector<1x1x1xf32>
    %cst_18 = arith.constant 8.192000e+03 : f32
    %49 = arith.divf %48, %cst_18 : f32
    %cst_19 = arith.constant 0.000000e+00 : f32
    %50 = vector.broadcast %cst_19 : f32 to vector<1x64xf32>
    %51 = arith.select %42, %8, %50 : vector<1x64xi1>, vector<1x64xf32>
    %52 = vector.shape_cast %51 : vector<1x64xf32> to vector<1x1x64xf32>
    %cst_20 = arith.constant dense<0.000000e+00> : vector<1xf32>
    %53 = vector.multi_reduction <add>, %52, %cst_20 [1, 2] : vector<1x1x64xf32> to vector<1xf32>
    %54 = vector.shape_cast %53 : vector<1xf32> to vector<1x1x1xf32>
    %55 = vector.extract %54[0, 0, 0] : f32 from vector<1x1x1xf32>
    %cst_21 = arith.constant 8.192000e+03 : f32
    %56 = arith.divf %55, %cst_21 : f32
    %57 = arith.mulf %49, %49 : f32
    %58 = arith.subf %56, %57 : f32
    %cst_22 = arith.constant 0.000000e+00 : f32
    %59 = arith.maximumf %58, %cst_22 : f32
    %60 = vector.broadcast %49 : f32 to vector<1x64xf32>
    %61 = arith.select %42, %60, %35 : vector<1x64xi1>, vector<1x64xf32>
    %62 = vector.broadcast %59 : f32 to vector<1x64xf32>
    %63 = arith.select %42, %62, %37 : vector<1x64xi1>, vector<1x64xf32>
    %cst_23 = arith.constant 9.99999974E-6 : f32
    %64 = vector.broadcast %cst_23 : f32 to vector<1x64xf32>
    %65 = arith.addf %63, %64 : vector<1x64xf32>
    %66 = math.rsqrt %65 : vector<1x64xf32>
    %c0_24 = arith.constant 0 : index
    %c0_25 = arith.constant 0 : index
    %67 = vector.load %arg3[%c0_24, %c0_25] : memref<1x64xf32, #tpu.memory_space<vmem>>, vector<1x64xf32>
    %68 = arith.mulf %66, %67 : vector<1x64xf32>
    %c0_26 = arith.constant 0 : index
    %c0_27 = arith.constant 0 : index
    %69 = vector.load %arg4[%c0_26, %c0_27] : memref<1x64xf32, #tpu.memory_space<vmem>>, vector<1x64xf32>
    %70 = arith.mulf %61, %68 : vector<1x64xf32>
    %71 = arith.subf %69, %70 : vector<1x64xf32>
    %72 = vector.broadcast %68 : vector<1x64xf32> to vector<256x64xf32>
    %73 = arith.mulf %3, %72 : vector<256x64xf32>
    %74 = vector.broadcast %71 : vector<1x64xf32> to vector<256x64xf32>
    %75 = arith.addf %73, %74 : vector<256x64xf32>
    %cst_28 = arith.constant 0.000000e+00 : f32
    %76 = vector.broadcast %cst_28 : f32 to vector<256x64xf32>
    %77 = arith.maximumf %75, %76 : vector<256x64xf32>
    %cst_29 = arith.constant 0.000000e+00 : f32
    %78 = vector.broadcast %cst_29 : f32 to vector<1x64xf32>
    %79 = vector.extract_strided_slice %77 {offsets = [0, 0], sizes = [16, 64], strides = [1, 1]} : vector<256x64xf32> to vector<16x64xf32>
    %80 = vector.extract_strided_slice %77 {offsets = [16, 0], sizes = [16, 64], strides = [1, 1]} : vector<256x64xf32> to vector<16x64xf32>
    %81 = arith.maximumf %79, %80 : vector<16x64xf32>
    %82 = vector.extract_strided_slice %81 {offsets = [0, 0], sizes = [15, 64], strides = [1, 1]} : vector<16x64xf32> to vector<15x64xf32>
    %83 = tpu.concatenate %78, %82 in 0 : vector<1x64xf32>, vector<15x64xf32> -> vector<16x64xf32>
    %84 = vector.extract_strided_slice %81 {offsets = [1, 0], sizes = [15, 64], strides = [1, 1]} : vector<16x64xf32> to vector<15x64xf32>
    %85 = tpu.concatenate %84, %78 in 0 : vector<15x64xf32>, vector<1x64xf32> -> vector<16x64xf32>
    %86 = arith.maximumf %83, %81 : vector<16x64xf32>
    %87 = arith.maximumf %86, %85 : vector<16x64xf32>
    %88 = vector.extract_strided_slice %77 {offsets = [16, 0], sizes = [16, 64], strides = [1, 1]} : vector<256x64xf32> to vector<16x64xf32>
    %89 = vector.extract_strided_slice %77 {offsets = [32, 0], sizes = [16, 64], strides = [1, 1]} : vector<256x64xf32> to vector<16x64xf32>
    %90 = vector.extract_strided_slice %77 {offsets = [48, 0], sizes = [16, 64], strides = [1, 1]} : vector<256x64xf32> to vector<16x64xf32>
    %91 = arith.maximumf %88, %89 : vector<16x64xf32>
    %92 = arith.maximumf %91, %90 : vector<16x64xf32>
    %93 = vector.extract_strided_slice %92 {offsets = [0, 0], sizes = [15, 64], strides = [1, 1]} : vector<16x64xf32> to vector<15x64xf32>
    %94 = tpu.concatenate %78, %93 in 0 : vector<1x64xf32>, vector<15x64xf32> -> vector<16x64xf32>
    %95 = vector.extract_strided_slice %92 {offsets = [1, 0], sizes = [15, 64], strides = [1, 1]} : vector<16x64xf32> to vector<15x64xf32>
    %96 = tpu.concatenate %95, %78 in 0 : vector<15x64xf32>, vector<1x64xf32> -> vector<16x64xf32>
    %97 = arith.maximumf %94, %92 : vector<16x64xf32>
    %98 = arith.maximumf %97, %96 : vector<16x64xf32>
    %99 = vector.extract_strided_slice %77 {offsets = [48, 0], sizes = [16, 64], strides = [1, 1]} : vector<256x64xf32> to vector<16x64xf32>
    %100 = vector.extract_strided_slice %77 {offsets = [64, 0], sizes = [16, 64], strides = [1, 1]} : vector<256x64xf32> to vector<16x64xf32>
    %101 = vector.extract_strided_slice %77 {offsets = [80, 0], sizes = [16, 64], strides = [1, 1]} : vector<256x64xf32> to vector<16x64xf32>
    %102 = arith.maximumf %99, %100 : vector<16x64xf32>
    %103 = arith.maximumf %102, %101 : vector<16x64xf32>
    %104 = vector.extract_strided_slice %103 {offsets = [0, 0], sizes = [15, 64], strides = [1, 1]} : vector<16x64xf32> to vector<15x64xf32>
    %105 = tpu.concatenate %78, %104 in 0 : vector<1x64xf32>, vector<15x64xf32> -> vector<16x64xf32>
    %106 = vector.extract_strided_slice %103 {offsets = [1, 0], sizes = [15, 64], strides = [1, 1]} : vector<16x64xf32> to vector<15x64xf32>
    %107 = tpu.concatenate %106, %78 in 0 : vector<15x64xf32>, vector<1x64xf32> -> vector<16x64xf32>
    %108 = arith.maximumf %105, %103 : vector<16x64xf32>
    %109 = arith.maximumf %108, %107 : vector<16x64xf32>
    %110 = vector.extract_strided_slice %77 {offsets = [80, 0], sizes = [16, 64], strides = [1, 1]} : vector<256x64xf32> to vector<16x64xf32>
    %111 = vector.extract_strided_slice %77 {offsets = [96, 0], sizes = [16, 64], strides = [1, 1]} : vector<256x64xf32> to vector<16x64xf32>
    %112 = vector.extract_strided_slice %77 {offsets = [112, 0], sizes = [16, 64], strides = [1, 1]} : vector<256x64xf32> to vector<16x64xf32>
    %113 = arith.maximumf %110, %111 : vector<16x64xf32>
    %114 = arith.maximumf %113, %112 : vector<16x64xf32>
    %115 = vector.extract_strided_slice %114 {offsets = [0, 0], sizes = [15, 64], strides = [1, 1]} : vector<16x64xf32> to vector<15x64xf32>
    %116 = tpu.concatenate %78, %115 in 0 : vector<1x64xf32>, vector<15x64xf32> -> vector<16x64xf32>
    %117 = vector.extract_strided_slice %114 {offsets = [1, 0], sizes = [15, 64], strides = [1, 1]} : vector<16x64xf32> to vector<15x64xf32>
    %118 = tpu.concatenate %117, %78 in 0 : vector<15x64xf32>, vector<1x64xf32> -> vector<16x64xf32>
    %119 = arith.maximumf %116, %114 : vector<16x64xf32>
    %120 = arith.maximumf %119, %118 : vector<16x64xf32>
    %121 = vector.extract_strided_slice %77 {offsets = [112, 0], sizes = [16, 64], strides = [1, 1]} : vector<256x64xf32> to vector<16x64xf32>
    %122 = vector.extract_strided_slice %77 {offsets = [128, 0], sizes = [16, 64], strides = [1, 1]} : vector<256x64xf32> to vector<16x64xf32>
    %123 = vector.extract_strided_slice %77 {offsets = [144, 0], sizes = [16, 64], strides = [1, 1]} : vector<256x64xf32> to vector<16x64xf32>
    %124 = arith.maximumf %121, %122 : vector<16x64xf32>
    %125 = arith.maximumf %124, %123 : vector<16x64xf32>
    %126 = vector.extract_strided_slice %125 {offsets = [0, 0], sizes = [15, 64], strides = [1, 1]} : vector<16x64xf32> to vector<15x64xf32>
    %127 = tpu.concatenate %78, %126 in 0 : vector<1x64xf32>, vector<15x64xf32> -> vector<16x64xf32>
    %128 = vector.extract_strided_slice %125 {offsets = [1, 0], sizes = [15, 64], strides = [1, 1]} : vector<16x64xf32> to vector<15x64xf32>
    %129 = tpu.concatenate %128, %78 in 0 : vector<15x64xf32>, vector<1x64xf32> -> vector<16x64xf32>
    %130 = arith.maximumf %127, %125 : vector<16x64xf32>
    %131 = arith.maximumf %130, %129 : vector<16x64xf32>
    %132 = vector.extract_strided_slice %77 {offsets = [144, 0], sizes = [16, 64], strides = [1, 1]} : vector<256x64xf32> to vector<16x64xf32>
    %133 = vector.extract_strided_slice %77 {offsets = [160, 0], sizes = [16, 64], strides = [1, 1]} : vector<256x64xf32> to vector<16x64xf32>
    %134 = vector.extract_strided_slice %77 {offsets = [176, 0], sizes = [16, 64], strides = [1, 1]} : vector<256x64xf32> to vector<16x64xf32>
    %135 = arith.maximumf %132, %133 : vector<16x64xf32>
    %136 = arith.maximumf %135, %134 : vector<16x64xf32>
    %137 = vector.extract_strided_slice %136 {offsets = [0, 0], sizes = [15, 64], strides = [1, 1]} : vector<16x64xf32> to vector<15x64xf32>
    %138 = tpu.concatenate %78, %137 in 0 : vector<1x64xf32>, vector<15x64xf32> -> vector<16x64xf32>
    %139 = vector.extract_strided_slice %136 {offsets = [1, 0], sizes = [15, 64], strides = [1, 1]} : vector<16x64xf32> to vector<15x64xf32>
    %140 = tpu.concatenate %139, %78 in 0 : vector<15x64xf32>, vector<1x64xf32> -> vector<16x64xf32>
    %141 = arith.maximumf %138, %136 : vector<16x64xf32>
    %142 = arith.maximumf %141, %140 : vector<16x64xf32>
    %143 = vector.extract_strided_slice %77 {offsets = [176, 0], sizes = [16, 64], strides = [1, 1]} : vector<256x64xf32> to vector<16x64xf32>
    %144 = vector.extract_strided_slice %77 {offsets = [192, 0], sizes = [16, 64], strides = [1, 1]} : vector<256x64xf32> to vector<16x64xf32>
    %145 = vector.extract_strided_slice %77 {offsets = [208, 0], sizes = [16, 64], strides = [1, 1]} : vector<256x64xf32> to vector<16x64xf32>
    %146 = arith.maximumf %143, %144 : vector<16x64xf32>
    %147 = arith.maximumf %146, %145 : vector<16x64xf32>
    %148 = vector.extract_strided_slice %147 {offsets = [0, 0], sizes = [15, 64], strides = [1, 1]} : vector<16x64xf32> to vector<15x64xf32>
    %149 = tpu.concatenate %78, %148 in 0 : vector<1x64xf32>, vector<15x64xf32> -> vector<16x64xf32>
    %150 = vector.extract_strided_slice %147 {offsets = [1, 0], sizes = [15, 64], strides = [1, 1]} : vector<16x64xf32> to vector<15x64xf32>
    %151 = tpu.concatenate %150, %78 in 0 : vector<15x64xf32>, vector<1x64xf32> -> vector<16x64xf32>
    %152 = arith.maximumf %149, %147 : vector<16x64xf32>
    %153 = arith.maximumf %152, %151 : vector<16x64xf32>
    %154 = vector.extract_strided_slice %77 {offsets = [208, 0], sizes = [16, 64], strides = [1, 1]} : vector<256x64xf32> to vector<16x64xf32>
    %155 = vector.extract_strided_slice %77 {offsets = [224, 0], sizes = [16, 64], strides = [1, 1]} : vector<256x64xf32> to vector<16x64xf32>
    %156 = vector.extract_strided_slice %77 {offsets = [240, 0], sizes = [16, 64], strides = [1, 1]} : vector<256x64xf32> to vector<16x64xf32>
    %157 = arith.maximumf %154, %155 : vector<16x64xf32>
    %158 = arith.maximumf %157, %156 : vector<16x64xf32>
    %159 = vector.extract_strided_slice %158 {offsets = [0, 0], sizes = [15, 64], strides = [1, 1]} : vector<16x64xf32> to vector<15x64xf32>
    %160 = tpu.concatenate %78, %159 in 0 : vector<1x64xf32>, vector<15x64xf32> -> vector<16x64xf32>
    %161 = vector.extract_strided_slice %158 {offsets = [1, 0], sizes = [15, 64], strides = [1, 1]} : vector<16x64xf32> to vector<15x64xf32>
    %162 = tpu.concatenate %161, %78 in 0 : vector<15x64xf32>, vector<1x64xf32> -> vector<16x64xf32>
    %163 = arith.maximumf %160, %158 : vector<16x64xf32>
    %164 = arith.maximumf %163, %162 : vector<16x64xf32>
    %165 = vector.shape_cast %87 : vector<16x64xf32> to vector<1x16x64xf32>
    %166 = vector.shape_cast %98 : vector<16x64xf32> to vector<1x16x64xf32>
    %167 = vector.shape_cast %109 : vector<16x64xf32> to vector<1x16x64xf32>
    %168 = vector.shape_cast %120 : vector<16x64xf32> to vector<1x16x64xf32>
    %169 = vector.shape_cast %131 : vector<16x64xf32> to vector<1x16x64xf32>
    %170 = vector.shape_cast %142 : vector<16x64xf32> to vector<1x16x64xf32>
    %171 = vector.shape_cast %153 : vector<16x64xf32> to vector<1x16x64xf32>
    %172 = vector.shape_cast %164 : vector<16x64xf32> to vector<1x16x64xf32>
    %173 = tpu.concatenate %165, %166, %167, %168, %169, %170, %171, %172 in 0 : vector<1x16x64xf32>, vector<1x16x64xf32>, vector<1x16x64xf32>, vector<1x16x64xf32>, vector<1x16x64xf32>, vector<1x16x64xf32>, vector<1x16x64xf32>, vector<1x16x64xf32> -> vector<8x16x64xf32>
    %c0_30 = arith.constant 0 : index
    %c0_31 = arith.constant 0 : index
    %c0_32 = arith.constant 0 : index
    %c0_33 = arith.constant 0 : index
    %174 = vector.load %arg5[%c0_30, %c0_31, %c0_32, %c0_33] : memref<1x8x16x64xf32, #tpu.memory_space<vmem>>, vector<1x8x16x64xf32>
    %175 = vector.shape_cast %174 : vector<1x8x16x64xf32> to vector<8x16x64xf32>
    %176 = vector.shape_cast %173 : vector<8x16x64xf32> to vector<1x8x16x64xf32>
    tpu.vector_store %arg5[%c0_30, %c0_31, %c0_32, %c0_33], %176 {strides = array<i32>} : memref<1x8x16x64xf32, #tpu.memory_space<vmem>>, vector<1x8x16x64xf32>,
    return
  }
  func.func @transform_0(%arg0: i32) -> (i32, i32, i32) {
    %c0_i32 = arith.constant 0 : i32
    %c0_i32_0 = arith.constant 0 : i32
    %c0_i32_1 = arith.constant 0 : i32
    return %arg0, %c0_i32, %c0_i32_0 : i32, i32, i32
  }
  func.func @transform_1(%arg0: i32) -> (i32, i32) {
    %c0_i32 = arith.constant 0 : i32
    %c0_i32_0 = arith.constant 0 : i32
    %c0_i32_1 = arith.constant 0 : i32
    return %c0_i32, %c0_i32_0 : i32, i32
  }
  func.func @transform_2(%arg0: i32) -> (i32, i32) {
    %c0_i32 = arith.constant 0 : i32
    %c0_i32_0 = arith.constant 0 : i32
    %c0_i32_1 = arith.constant 0 : i32
    return %c0_i32, %c0_i32_0 : i32, i32
  }
  func.func @transform_3(%arg0: i32) -> (i32, i32) {
    %c0_i32 = arith.constant 0 : i32
    %c0_i32_0 = arith.constant 0 : i32
    %c0_i32_1 = arith.constant 0 : i32
    return %c0_i32, %c0_i32_0 : i32, i32
  }
  func.func @transform_4(%arg0: i32) -> (i32, i32, i32, i32) {
    %c0_i32 = arith.constant 0 : i32
    %c0_i32_0 = arith.constant 0 : i32
    %c0_i32_1 = arith.constant 0 : i32
    %c0_i32_2 = arith.constant 0 : i32
    return %arg0, %c0_i32, %c0_i32_0, %c0_i32_1 : i32, i32, i32, i32
  }
}

</mosaic_0001>

<bundles_post_ra>
// kernel: resnet1_forward.1
= control target key start
LH: loop header
LB: loop body
LE: loop exit
PB: predicated region body
PF: predicated region fallthrough
CT: control target
= control target key end

     0   :  { %s1277_s15 = smov 0   ;;  %s1979_s0 = inlined_call_operand.vmem [shape: f32[2,256,256], index: 0, kind: input, shape index: {}]   ;;  %s1980_s1 = inlined_call_operand.vmem [shape: f32[256,64], index: 1, kind: input, shape index: {}]   ;;  %s1981_s2 = inlined_call_operand.vmem [shape: f32[1,64], index: 2, kind: input, shape index: {}]   ;;  %s1982_s3 = inlined_call_operand.vmem [shape: f32[1,64], index: 3, kind: input, shape index: {}]   ;;  %s1983_s4 = inlined_call_operand.vmem [shape: f32[2,8,16,64], index: 4, kind: output, shape index: {}]  }
   0x1 LB: > { %s1129_s16 = sadd.s32 4294967295, %s1248_s15   ;;  %p1133_p0 = scmp.ge.s32.totalorder %s1248_s15, 1  ;;  %s1248_s15 = sphi %s1277_s15, %s14_s15  }
   0x2   : > { %p162_p1 = scmp.lt.s32.totalorder %s1248_s15, 3 }
   0x4   : > { %p163_p2 = pnand %p1133_p0, %p162_p1 }
   0x5   : > { %v262_v0 = vld [vmem:[%s1980_s1] sm:$0xff] (!%p163_p2)  ;;  %v263_v1 = vld [vmem:[%s1980_s1 + $0x8] sm:$0xff] (!%p163_p2)  ;;  %v264_v2 = vld [vmem:[%s1980_s1 + $0x10] sm:$0xff] (!%p163_p2)  ;;  %p188_p3 = scmp.lt.s32.totalorder (!%p163_p2), %s1129_s16, 1  ;;  %v1250_v3 = vmov (!%p163_p2), 0.0|0.0   ;;  %vm519_vm0 = vcmask (!%p163_p2), 523264  }
   0x6   : > { %166 = sbr.rel (%p163_p2) target bundleno = 690 (0x2b2), region = 36  ;;  %1142 = vmatprep.subr.bf16.mxu0 (!%p163_p2), %v1250_v3  ;;  %v1143_v4 = vpack.c.bf16 (!%p163_p2), %v263_v1, %v262_v0  ;;  %v265_v5 = vld [vmem:[%s1980_s1 + $0x18] sm:$0xff] (!%p163_p2)  ;;  %1190 = vmatprep.subr.bf16.mxu1 (!%p163_p2), %v1250_v3  ;;  %v266_v7 = vld [vmem:[%s1980_s1 + $0x20] sm:$0xff] (!%p163_p2)  ;;  %v267_v8 = vld [vmem:[%s1980_s1 + $0x28] sm:$0xff] (!%p163_p2)  ;;  %vm696_vm5 = vcmask (!%p163_p2), 516096   ;;  %s1251_s25 = smov (!%p163_p2), 0.0  }
   0x7   : > { %v1146_v6 = vpack.c.bf16 (!%p163_p2), %v265_v5, %v264_v2  ;;  %v1149_v9 = vpack.c.bf16 (!%p163_p2), %v267_v8, %v266_v7  ;;  %v268_v10 = vld [vmem:[%s1980_s1 + $0x30] sm:$0xff] (!%p163_p2)  ;;  %v269_v11 = vld [vmem:[%s1980_s1 + $0x38] sm:$0xff] (!%p163_p2)  ;;  %v270_v14 = vld [vmem:[%s1980_s1 + $0x40] sm:$0xff] (!%p163_p2)  ;;  %vm886_vm6 = vcmask (!%p163_p2), 1040384   ;;  %vm893_vm7 = vcmask (!%p163_p2), 1046528  }
   0x8   : > { %1144 = vmatpush1.bf16.msra.mxu0 (!%p163_p2), %v1143_v4  ;;  %1206 = vmatpush1.bf16.msra.mxu1 (!%p163_p2), %v1143_v4  ;;  %v1152_v13 = vpack.c.bf16 (!%p163_p2), %v269_v11, %v268_v10  ;;  %v271_v15 = vld [vmem:[%s1980_s1 + $0x48] sm:$0xff] (!%p163_p2)  ;;  %v272_v17 = vld [vmem:[%s1980_s1 + $0x50] sm:$0xff] (!%p163_p2)  ;;  %v273_v18 = vld [vmem:[%s1980_s1 + $0x58] sm:$0xff] (!%p163_p2) }
   0x9   : > { %1145 = vmatprep.subr.bf16.mxu0 (!%p163_p2), %v1250_v3  ;;  %1191 = vmatprep.subr.bf16.mxu1 (!%p163_p2), %v1250_v3  ;;  %v1155_v16 = vpack.c.bf16 (!%p163_p2), %v271_v15, %v270_v14  ;;  %v1158_v20 = vpack.c.bf16 (!%p163_p2), %v273_v18, %v272_v17  ;;  %v274_v21 = vld [vmem:[%s1980_s1 + $0x60] sm:$0xff] (!%p163_p2)  ;;  %v275_v22 = vld [vmem:[%s1980_s1 + $0x68] sm:$0xff] (!%p163_p2)  ;;  %v276_v24 = vld [vmem:[%s1980_s1 + $0x70] sm:$0xff] (!%p163_p2) }
   0xa   : > { %v1161_v23 = vpack.c.bf16 (!%p163_p2), %v275_v22, %v274_v21  ;;  %v277_v25 = vld [vmem:[%s1980_s1 + $0x78] sm:$0xff] (!%p163_p2)  ;;  %v278_v27 = vld [vmem:[%s1980_s1 + $0x80] sm:$0xff] (!%p163_p2)  ;;  %v279_v28 = vld [vmem:[%s1980_s1 + $0x88] sm:$0xff] (!%p163_p2) }
   0xb   : > { %v1164_v26 = vpack.c.bf16 (!%p163_p2), %v277_v25, %v276_v24  ;;  %v1167_v29 = vpack.c.bf16 (!%p163_p2), %v279_v28, %v278_v27  ;;  %v280_v30 = vld [vmem:[%s1980_s1 + $0x90] sm:$0xff] (!%p163_p2)  ;;  %v281_v31 = vld [vmem:[%s1980_s1 + $0x98] sm:$0xff] (!%p163_p2)  ;;  %v282_v33 = vld [vmem:[%s1980_s1 + $0xa0] sm:$0xff] (!%p163_p2) }
   0xc   : > { %1147 = vmatpush1.bf16.msra.mxu0 (!%p163_p2), %v1146_v6  ;;  %1207 = vmatpush1.bf16.msra.mxu1 (!%p163_p2), %v1146_v6  ;;  %v1170_v32 = vpack.c.bf16 (!%p163_p2), %v281_v31, %v280_v30  ;;  %v283_v34 = vld [vmem:[%s1980_s1 + $0xa8] sm:$0xff] (!%p163_p2)  ;;  %v284_v36 = vld [vmem:[%s1980_s1 + $0xb0] sm:$0xff] (!%p163_p2)  ;;  %v285_v37 = vld [vmem:[%s1980_s1 + $0xb8] sm:$0xff] (!%p163_p2) }
   0xd   : > { %s1988_s16 = smov (!%p188_p3, %s1129_s16), 1  ;;  %1148 = vmatprep.subr.bf16.mxu0 %v1250_v3  ;;  %1192 = vmatprep.subr.bf16.mxu1 %v1250_v3  ;;  %v1173_v35 = vpack.c.bf16 %v283_v34, %v282_v33  ;;  %v1176_v38 = vpack.c.bf16 %v285_v37, %v284_v36  ;;  %v286_v39 = vld [vmem:[%s1980_s1 + $0xc0] sm:$0xff]  ;;  %v287_v40 = vld [vmem:[%s1980_s1 + $0xc8] sm:$0xff]  ;;  %v288_v42 = vld [vmem:[%s1980_s1 + $0xd0] sm:$0xff] }
   0xe   : > { %s1140_s29 = sshll.u32 %s1988_s16, 9  ;;  %v1179_v41 = vpack.c.bf16 %v287_v40, %v286_v39  ;;  %v289_v43 = vld [vmem:[%s1980_s1 + $0xd8] sm:$0xff]  ;;  %v290_v45 = vld [vmem:[%s1980_s1 + $0xe0] sm:$0xff]  ;;  %v291_v46 = vld [vmem:[%s1980_s1 + $0xe8] sm:$0xff]  ;;  %s1141_s8 = sshll.u32 %s1988_s16, 7 }
   0xf   : > { %s1313_s6 = scalar_lea.vmem %s1979_s0, %s1140_s29  ;;  %v1182_v44 = vpack.c.bf16 %v289_v43, %v288_v42  ;;  %v1185_v47 = vpack.c.bf16 %v291_v46, %v290_v45  ;;  %v292_v48 = vld [vmem:[%s1980_s1 + $0xf0] sm:$0xff]  ;;  %v293_v49 = vld [vmem:[%s1980_s1 + $0xf8] sm:$0xff]  ;;  %s1864_s16 = scalar_lea.vmem %s1983_s4, %s1141_s8 }
  0x10   : > { %v199_v12 = vld [vmem:[%s1313_s6 + $0x8] sm:$0xff]  ;;  %1150 = vmatpush1.bf16.msra.mxu0 %v1149_v9  ;;  %1208 = vmatpush1.bf16.msra.mxu1 %v1149_v9  ;;  %v1188_v50 = vpack.c.bf16 %v293_v49, %v292_v48  ;;  %v198_v51 = vld [vmem:[%s1313_s6] sm:$0xff]  ;;  %v201_v53 = vld [vmem:[%s1313_s6 + $0x18] sm:$0xff] }
  0x11   : > { %1151 = vmatprep.subr.bf16.mxu0 %v1250_v3  ;;  %1193 = vmatprep.subr.bf16.mxu1 %v1250_v3  ;;  %v231_v19 = vld [vmem:[%s1313_s6 + $0x108] sm:$0xff]  ;;  %v230_v52 = vld [vmem:[%s1313_s6 + $0x100] sm:$0xff]  ;;  %v233_v54 = vld [vmem:[%s1313_s6 + $0x118] sm:$0xff] }
  0x12   : > { %358 = vmatprep.mubr.f32.mxu0 %v199_v12  ;;  %438 = vmatprep.mubr.f32.mxu1 %v231_v19  ;;  %v200_v55 = vld [vmem:[%s1313_s6 + $0x10] sm:$0xff]  ;;  %v203_v57 = vld [vmem:[%s1313_s6 + $0x28] sm:$0xff]  ;;  %v202_v59 = vld [vmem:[%s1313_s6 + $0x20] sm:$0xff] }
  0x13   : > { %v232_v56 = vld [vmem:[%s1313_s6 + $0x110] sm:$0xff]  ;;  %v235_v58 = vld [vmem:[%s1313_s6 + $0x128] sm:$0xff]  ;;  %v234_v60 = vld [vmem:[%s1313_s6 + $0x120] sm:$0xff] }
  0x14   : > { %1153 = vmatpush1.bf16.msra.mxu0 %v1152_v13  ;;  %1209 = vmatpush1.bf16.msra.mxu1 %v1152_v13  ;;  %v205_v61 = vld [vmem:[%s1313_s6 + $0x38] sm:$0xff]  ;;  %v204_v63 = vld [vmem:[%s1313_s6 + $0x30] sm:$0xff]  ;;  %v207_v1 = vld [vmem:[%s1313_s6 + $0x48] sm:$0xff] }
  0x15   : > { %1154 = vmatprep.subr.bf16.mxu0 %v1250_v3  ;;  %1194 = vmatprep.subr.bf16.mxu1 %v1250_v3  ;;  %v237_v62 = vld [vmem:[%s1313_s6 + $0x138] sm:$0xff]  ;;  %v236_v0 = vld [vmem:[%s1313_s6 + $0x130] sm:$0xff]  ;;  %v239_v2 = vld [vmem:[%s1313_s6 + $0x148] sm:$0xff] }
  0x16   : > { %v238_v4 = vld [vmem:[%s1313_s6 + $0x140] sm:$0xff]  ;;  %v209_v5 = vld [vmem:[%s1313_s6 + $0x58] sm:$0xff]  ;;  %v208_v7 = vld [vmem:[%s1313_s6 + $0x50] sm:$0xff] }
  0x17   : > { %v241_v6 = vld [vmem:[%s1313_s6 + $0x158] sm:$0xff]  ;;  %v240_v8 = vld [vmem:[%s1313_s6 + $0x150] sm:$0xff]  ;;  %v211_v9 = vld [vmem:[%s1313_s6 + $0x68] sm:$0xff] }
  0x18   : > { %1156 = vmatpush1.bf16.msra.mxu0 %v1155_v16  ;;  %1210 = vmatpush1.bf16.msra.mxu1 %v1155_v16  ;;  %v243_v10 = vld [vmem:[%s1313_s6 + $0x168] sm:$0xff]  ;;  %v210_v11 = vld [vmem:[%s1313_s6 + $0x60] sm:$0xff]  ;;  %v213_v13 = vld [vmem:[%s1313_s6 + $0x78] sm:$0xff] }
  0x19   : > { %1157 = vmatprep.subr.bf16.mxu0 %v1250_v3  ;;  %1195 = vmatprep.subr.bf16.mxu1 %v1250_v3  ;;  %v242_v12 = vld [vmem:[%s1313_s6 + $0x160] sm:$0xff]  ;;  %v245_v14 = vld [vmem:[%s1313_s6 + $0x178] sm:$0xff]  ;;  %v212_v15 = vld [vmem:[%s1313_s6 + $0x70] sm:$0xff] }
  0x1a   : > { %v244_v16 = vld [vmem:[%s1313_s6 + $0x170] sm:$0xff]  ;;  %v215_v17 = vld [vmem:[%s1313_s6 + $0x88] sm:$0xff]  ;;  %v214_v19 = vld [vmem:[%s1313_s6 + $0x80] sm:$0xff] }
  0x1b   : > { %v247_v18 = vld [vmem:[%s1313_s6 + $0x188] sm:$0xff]  ;;  %v217_v21 = vld [vmem:[%s1313_s6 + $0x98] sm:$0xff]  ;;  %v248_v24 = vld [vmem:[%s1313_s6 + $0x190] sm:$0xff] }
  0x1c   : > { %1159 = vmatpush1.bf16.msra.mxu0 %v1158_v20  ;;  %1211 = vmatpush1.bf16.msra.mxu1 %v1158_v20  ;;  %v246_v20 = vld [vmem:[%s1313_s6 + $0x180] sm:$0xff]  ;;  %v249_v22 = vld [vmem:[%s1313_s6 + $0x198] sm:$0xff]  ;;  %v219_v25 = vld [vmem:[%s1313_s6 + $0xa8] sm:$0xff] }
  0x1d   : > { %1160 = vmatprep.subr.bf16.mxu0 %v1250_v3  ;;  %1196 = vmatprep.subr.bf16.mxu1 %v1250_v3  ;;  %v218_v27 = vld [vmem:[%s1313_s6 + $0xa0] sm:$0xff]  ;;  %v253_v30 = vld [vmem:[%s1313_s6 + $0x1b8] sm:$0xff]  ;;  %v220_v31 = vld [vmem:[%s1313_s6 + $0xb0] sm:$0xff] }
  0x1e   : > { %v250_v28 = vld [vmem:[%s1313_s6 + $0x1a0] sm:$0xff]  ;;  %v223_v33 = vld [vmem:[%s1313_s6 + $0xc8] sm:$0xff]  ;;  %v225_v37 = vld [vmem:[%s1313_s6 + $0xd8] sm:$0xff] }
  0x1f   : > { %v255_v34 = vld [vmem:[%s1313_s6 + $0x1c8] sm:$0xff]  ;;  %v254_v36 = vld [vmem:[%s1313_s6 + $0x1c0] sm:$0xff]  ;;  %v224_v39 = vld [vmem:[%s1313_s6 + $0xd0] sm:$0xff] }
  0x20   : > { %1162 = vmatpush1.bf16.msra.mxu0 %v1161_v23  ;;  %1212 = vmatpush1.bf16.msra.mxu1 %v1161_v23  ;;  %v216_v23 = vld [vmem:[%s1313_s6 + $0x90] sm:$0xff]  ;;  %v259_v42 = vld [vmem:[%s1313_s6 + $0x1e8] sm:$0xff]  ;;  %v226_v43 = vld [vmem:[%s1313_s6 + $0xe0] sm:$0xff] }
  0x21   : > { %1163 = vmatprep.subr.bf16.mxu0 %v1250_v3  ;;  %1197 = vmatprep.subr.bf16.mxu1 %v1250_v3  ;;  %v256_v40 = vld [vmem:[%s1313_s6 + $0x1d0] sm:$0xff]  ;;  %v229_v45 = vld [vmem:[%s1313_s6 + $0xf8] sm:$0xff] }
  0x22   : > { %v261_v46 = vld [vmem:[%s1313_s6 + $0x1f8] sm:$0xff]  ;;  %v260_v48 = vld [vmem:[%s1313_s6 + $0x1f0] sm:$0xff] }
  0x24   : > { %1165 = vmatpush1.bf16.msra.mxu0 %v1164_v26  ;;  %1213 = vmatpush1.bf16.msra.mxu1 %v1164_v26  ;;  %v251_v26 = vld [vmem:[%s1313_s6 + $0x1a8] sm:$0xff] }
  0x25   : > { %1166 = vmatprep.subr.bf16.mxu0 %v1250_v3  ;;  %1198 = vmatprep.subr.bf16.mxu1 %v1250_v3 }
  0x28   : > { %1168 = vmatpush1.bf16.msra.mxu0 %v1167_v29  ;;  %1214 = vmatpush1.bf16.msra.mxu1 %v1167_v29  ;;  %v221_v29 = vld [vmem:[%s1313_s6 + $0xb8] sm:$0xff] }
  0x29   : > { %1169 = vmatprep.subr.bf16.mxu0 %v1250_v3  ;;  %1199 = vmatprep.subr.bf16.mxu1 %v1250_v3 }
  0x2c   : > { %1171 = vmatpush1.bf16.msra.mxu0 %v1170_v32  ;;  %1215 = vmatpush1.bf16.msra.mxu1 %v1170_v32  ;;  %v252_v32 = vld [vmem:[%s1313_s6 + $0x1b0] sm:$0xff] }
  0x2d   : > { %1172 = vmatprep.subr.bf16.mxu0 %v1250_v3  ;;  %1200 = vmatprep.subr.bf16.mxu1 %v1250_v3 }
  0x30   : > { %1174 = vmatpush1.bf16.msra.mxu0 %v1173_v35  ;;  %1216 = vmatpush1.bf16.msra.mxu1 %v1173_v35  ;;  %v222_v35 = vld [vmem:[%s1313_s6 + $0xc0] sm:$0xff] }
  0x31   : > { %1175 = vmatprep.subr.bf16.mxu0 %v1250_v3  ;;  %1201 = vmatprep.subr.bf16.mxu1 %v1250_v3 }
  0x34   : > { %1177 = vmatpush1.bf16.msra.mxu0 %v1176_v38  ;;  %1217 = vmatpush1.bf16.msra.mxu1 %v1176_v38  ;;  %v257_v38 = vld [vmem:[%s1313_s6 + $0x1d8] sm:$0xff] }
  0x35   : > { %1178 = vmatprep.subr.bf16.mxu0 %v1250_v3  ;;  %1202 = vmatprep.subr.bf16.mxu1 %v1250_v3 }
  0x38   : > { %1180 = vmatpush1.bf16.msra.mxu0 %v1179_v41  ;;  %1218 = vmatpush1.bf16.msra.mxu1 %v1179_v41  ;;  %v227_v41 = vld [vmem:[%s1313_s6 + $0xe8] sm:$0xff] }
  0x39   : > { %1181 = vmatprep.subr.bf16.mxu0 %v1250_v3  ;;  %1203 = vmatprep.subr.bf16.mxu1 %v1250_v3 }
  0x3c   : > { %1183 = vmatpush1.bf16.msra.mxu0 %v1182_v44  ;;  %1219 = vmatpush1.bf16.msra.mxu1 %v1182_v44  ;;  %v258_v44 = vld [vmem:[%s1313_s6 + $0x1e0] sm:$0xff] }
  0x3d   : > { %1184 = vmatprep.subr.bf16.mxu0 %v1250_v3  ;;  %1204 = vmatprep.subr.bf16.mxu1 %v1250_v3 }
  0x40   : > { %1186 = vmatpush1.bf16.msra.mxu0 %v1185_v47  ;;  %1220 = vmatpush1.bf16.msra.mxu1 %v1185_v47  ;;  %v228_v47 = vld [vmem:[%s1313_s6 + $0xf0] sm:$0xff] }
  0x41   : > { %1187 = vmatprep.subr.bf16.mxu0 %v1250_v3  ;;  %1205 = vmatprep.subr.bf16.mxu1 %v1250_v3  ;;  %v206_v3 = vld [vmem:[%s1313_s6 + $0x40] sm:$0xff] }
  0x44   : > { %1189 = vmatpush1.bf16.msra.mxu0 %v1188_v50  ;;  %1221 = vmatpush1.bf16.msra.mxu1 %v1188_v50 }
  0x47   : > { %359 = vmatmul.mubr.f32.vlgmr.msra.gmra.mrb[0].mxu0 %v198_v51  ;;  %439 = vmatmul.mubr.f32.vlgmr.msra.gmra.mrb[0].mxu1 %v230_v52 }
  0x48   : > { %363 = vmatprep.mubr.f32.mxu0 %v201_v53  ;;  %443 = vmatprep.mubr.f32.mxu1 %v233_v54 }
  0x4b   : > { %364 = vmatmul.mubr.f32.gmra.mrb[2].mxu0 %v200_v55  ;;  %444 = vmatmul.mubr.f32.gmra.mrb[2].mxu1 %v232_v56 }
  0x4c   : > { %368 = vmatprep.mubr.f32.mxu0 %v203_v57  ;;  %448 = vmatprep.mubr.f32.mxu1 %v235_v58 }
  0x4f   : > { %369 = vmatmul.mubr.f32.gmra.mrb[4].mxu0 %v202_v59  ;;  %449 = vmatmul.mubr.f32.gmra.mrb[4].mxu1 %v234_v60 }
  0x50   : > { %373 = vmatprep.mubr.f32.mxu0 %v205_v61  ;;  %453 = vmatprep.mubr.f32.mxu1 %v237_v62 }
  0x53   : > { %374 = vmatmul.mubr.f32.gmra.mrb[6].mxu0 %v204_v63  ;;  %454 = vmatmul.mubr.f32.gmra.mrb[6].mxu1 %v236_v0 }
  0x54   : > { %378 = vmatprep.mubr.f32.mxu0 %v207_v1  ;;  %458 = vmatprep.mubr.f32.mxu1 %v239_v2 }
  0x57   : > { %379 = vmatmul.mubr.f32.gmra.mrb[8].mxu0 %v206_v3  ;;  %459 = vmatmul.mubr.f32.gmra.mrb[8].mxu1 %v238_v4 }
  0x58   : > { %383 = vmatprep.mubr.f32.mxu0 %v209_v5  ;;  %463 = vmatprep.mubr.f32.mxu1 %v241_v6 }
  0x5b   : > { %384 = vmatmul.mubr.f32.gmra.mrb[10].mxu0 %v208_v7  ;;  %464 = vmatmul.mubr.f32.gmra.mrb[10].mxu1 %v240_v8 }
  0x5c   : > { %388 = vmatprep.mubr.f32.mxu0 %v211_v9  ;;  %468 = vmatprep.mubr.f32.mxu1 %v243_v10 }
  0x5f   : > { %389 = vmatmul.mubr.f32.gmra.mrb[12].mxu0 %v210_v11  ;;  %469 = vmatmul.mubr.f32.gmra.mrb[12].mxu1 %v242_v12 }
  0x60   : > { %393 = vmatprep.mubr.f32.mxu0 %v213_v13  ;;  %473 = vmatprep.mubr.f32.mxu1 %v245_v14 }
  0x63   : > { %394 = vmatmul.mubr.f32.gmra.mrb[14].mxu0 %v212_v15  ;;  %474 = vmatmul.mubr.f32.gmra.mrb[14].mxu1 %v244_v16 }
  0x64   : > { %398 = vmatprep.mubr.f32.mxu0 %v215_v17  ;;  %478 = vmatprep.mubr.f32.mxu1 %v247_v18 }
  0x67   : > { %399 = vmatmul.mubr.f32.gmra.mrb[16].mxu0 %v214_v19  ;;  %479 = vmatmul.mubr.f32.gmra.mrb[16].mxu1 %v246_v20 }
  0x68   : > { %403 = vmatprep.mubr.f32.mxu0 %v217_v21  ;;  %483 = vmatprep.mubr.f32.mxu1 %v249_v22 }
  0x6b   : > { %404 = vmatmul.mubr.f32.gmra.mrb[18].mxu0 %v216_v23  ;;  %484 = vmatmul.mubr.f32.gmra.mrb[18].mxu1 %v248_v24 }
  0x6c   : > { %408 = vmatprep.mubr.f32.mxu0 %v219_v25  ;;  %488 = vmatprep.mubr.f32.mxu1 %v251_v26 }
  0x6f   : > { %409 = vmatmul.mubr.f32.gmra.mrb[20].mxu0 %v218_v27  ;;  %489 = vmatmul.mubr.f32.gmra.mrb[20].mxu1 %v250_v28 }
  0x70   : > { %413 = vmatprep.mubr.f32.mxu0 %v221_v29  ;;  %493 = vmatprep.mubr.f32.mxu1 %v253_v30 }
  0x73   : > { %414 = vmatmul.mubr.f32.gmra.mrb[22].mxu0 %v220_v31  ;;  %494 = vmatmul.mubr.f32.gmra.mrb[22].mxu1 %v252_v32 }
  0x74   : > { %418 = vmatprep.mubr.f32.mxu0 %v223_v33  ;;  %498 = vmatprep.mubr.f32.mxu1 %v255_v34 }
  0x77   : > { %419 = vmatmul.mubr.f32.gmra.mrb[24].mxu0 %v222_v35  ;;  %499 = vmatmul.mubr.f32.gmra.mrb[24].mxu1 %v254_v36 }
  0x78   : > { %423 = vmatprep.mubr.f32.mxu0 %v225_v37  ;;  %503 = vmatprep.mubr.f32.mxu1 %v257_v38 }
  0x7b   : > { %424 = vmatmul.mubr.f32.gmra.mrb[26].mxu0 %v224_v39  ;;  %504 = vmatmul.mubr.f32.gmra.mrb[26].mxu1 %v256_v40 }
  0x7c   : > { %428 = vmatprep.mubr.f32.mxu0 %v227_v41  ;;  %508 = vmatprep.mubr.f32.mxu1 %v259_v42 }
  0x7f   : > { %429 = vmatmul.mubr.f32.gmra.mrb[28].mxu0 %v226_v43  ;;  %509 = vmatmul.mubr.f32.gmra.mrb[28].mxu1 %v258_v44 }
  0x80   : > { %433 = vmatprep.mubr.f32.mxu0 %v229_v45  ;;  %513 = vmatprep.mubr.f32.mxu1 %v261_v46 }
  0x83   : > { %434 = vmatmul.mubr.f32.gmra.mrb[30].mxu0 %v228_v47  ;;  %514 = vmatmul.mubr.f32.gmra.mrb[30].mxu1 %v260_v48 }
 0x11a   : > { %v1485_v49 = vpop.f32.mrb[0].mxu0  ;;  %v1487_v50 = vpop.f32.mrb[0].mxu1 }
 0x11b   : > { %v362_v51 = vpop.f32.mrb[1].mxu0  ;;  %v442_v52 = vpop.f32.mrb[1].mxu1  ;;  %v589_v53 = vmul.f32 %v1485_v49, %v1485_v49  ;;  %v520_v56 = vsel %vm519_vm0, %v1485_v49, 0.0 }
 0x11d   : > { %v621_v62 = vsel %vm519_vm0, %v589_v53, 0.0 }
 0x11e   : > { %v1491_v54 = vpop.f32.mrb[2].mxu0  ;;  %v1493_v55 = vpop.f32.mrb[2].mxu1 }
 0x11f   : > { %v521_v57 = vsel %vm519_vm0, %v1491_v54, 0.0  ;;  %v590_v58 = vmul.f32 %v1491_v54, %v1491_v54  ;;  %v367_v59 = vpop.f32.mrb[3].mxu0  ;;  %v447_v60 = vpop.f32.mrb[3].mxu1 }
 0x120   : > { %v522_v61 = vadd.f32 %v521_v57, %v520_v56 }
 0x121   : > { %v622_v63 = vsel %vm519_vm0, %v590_v58, 0.0 }
 0x122   : > { %v623_v0 = vadd.f32 %v622_v63, %v621_v62  ;;  %v1503_v1 = vpop.f32.mrb[4].mxu0  ;;  %v1505_v2 = vpop.f32.mrb[4].mxu1 }
 0x123   : > { %v523_v3 = vsel %vm519_vm0, %v1503_v1, 0.0  ;;  %v591_v4 = vmul.f32 %v1503_v1, %v1503_v1  ;;  %v372_v5 = vpop.f32.mrb[5].mxu0  ;;  %v452_v6 = vpop.f32.mrb[5].mxu1 }
 0x124   : > { %v524_v7 = vadd.f32 %v523_v3, %v522_v61 }
 0x125   : > { %v624_v8 = vsel %vm519_vm0, %v591_v4, 0.0 }
 0x126   : > { %v625_v9 = vadd.f32 %v624_v8, %v623_v0  ;;  %v1512_v10 = vpop.f32.mrb[6].mxu0  ;;  %v1514_v11 = vpop.f32.mrb[6].mxu1 }
 0x127   : > { %v525_v12 = vsel %vm519_vm0, %v1512_v10, 0.0  ;;  %v592_v13 = vmul.f32 %v1512_v10, %v1512_v10  ;;  %v377_v14 = vpop.f32.mrb[7].mxu0  ;;  %v457_v15 = vpop.f32.mrb[7].mxu1 }
 0x128   : > { %v526_v16 = vadd.f32 %v525_v12, %v524_v7 }
 0x129   : > { %v626_v17 = vsel %vm519_vm0, %v592_v13, 0.0 }
 0x12a   : > { %v627_v18 = vadd.f32 %v626_v17, %v625_v9  ;;  %v1521_v19 = vpop.f32.mrb[8].mxu0  ;;  %v1523_v20 = vpop.f32.mrb[8].mxu1 }
 0x12b   : > { %v527_v21 = vsel %vm519_vm0, %v1521_v19, 0.0  ;;  %v593_v22 = vmul.f32 %v1521_v19, %v1521_v19  ;;  %v382_v23 = vpop.f32.mrb[9].mxu0  ;;  %v462_v24 = vpop.f32.mrb[9].mxu1 }
 0x12c   : > { %v528_v25 = vadd.f32 %v527_v21, %v526_v16 }
 0x12d   : > { %v628_v26 = vsel %vm519_vm0, %v593_v22, 0.0 }
 0x12e   : > { %v629_v27 = vadd.f32 %v628_v26, %v627_v18  ;;  %v1530_v28 = vpop.f32.mrb[10].mxu0  ;;  %v1532_v29 = vpop.f32.mrb[10].mxu1 }
 0x12f   : > { %v529_v30 = vsel %vm519_vm0, %v1530_v28, 0.0  ;;  %v594_v31 = vmul.f32 %v1530_v28, %v1530_v28  ;;  %v387_v32 = vpop.f32.mrb[11].mxu0  ;;  %v467_v33 = vpop.f32.mrb[11].mxu1 }
 0x130   : > { %v530_v34 = vadd.f32 %v529_v30, %v528_v25 }
 0x131   : > { %v630_v35 = vsel %vm519_vm0, %v594_v31, 0.0 }
 0x132   : > { %v631_v36 = vadd.f32 %v630_v35, %v629_v27  ;;  %v1539_v37 = vpop.f32.mrb[12].mxu0  ;;  %v1541_v38 = vpop.f32.mrb[12].mxu1 }
 0x133   : > { %v531_v39 = vsel %vm519_vm0, %v1539_v37, 0.0  ;;  %v595_v40 = vmul.f32 %v1539_v37, %v1539_v37  ;;  %v392_v41 = vpop.f32.mrb[13].mxu0  ;;  %v472_v42 = vpop.f32.mrb[13].mxu1 }
 0x134   : > { %v532_v43 = vadd.f32 %v531_v39, %v530_v34 }
 0x135   : > { %v632_v44 = vsel %vm519_vm0, %v595_v40, 0.0 }
 0x136   : > { %v633_v45 = vadd.f32 %v632_v44, %v631_v36  ;;  %v1548_v46 = vpop.f32.mrb[14].mxu0  ;;  %v1550_v47 = vpop.f32.mrb[14].mxu1 }
 0x137   : > { %v533_v48 = vsel %vm519_vm0, %v1548_v46, 0.0  ;;  %v596_v51 = vmul.f32 %v1548_v46, %v1548_v46  ;;  %v397_v52 = vpop.f32.mrb[15].mxu0  ;;  %v477_v53 = vpop.f32.mrb[15].mxu1 }
 0x138   : > { %v534_v56 = vadd.f32 %v533_v48, %v532_v43 }
 0x139   : > { %v634_v57 = vsel %vm519_vm0, %v596_v51, 0.0 }
 0x13a   : > { %v635_v58 = vadd.f32 %v634_v57, %v633_v45  ;;  %v1557_v59 = vpop.f32.mrb[16].mxu0  ;;  %v1559_v60 = vpop.f32.mrb[16].mxu1 }
 0x13b   : > { %v535_v61 = vsel %vm519_vm0, %v1557_v59, 0.0  ;;  %v597_v62 = vmul.f32 %v1557_v59, %v1557_v59  ;;  %v402_v63 = vpop.f32.mrb[17].mxu0  ;;  %v482_v0 = vpop.f32.mrb[17].mxu1 }
 0x13c   : > { %v536_v3 = vadd.f32 %v535_v61, %v534_v56 }
 0x13d   : > { %v636_v4 = vsel %vm519_vm0, %v597_v62, 0.0 }
 0x13e   : > { %v637_v5 = vadd.f32 %v636_v4, %v635_v58  ;;  %v1566_v6 = vpop.f32.mrb[18].mxu0  ;;  %v1568_v7 = vpop.f32.mrb[18].mxu1 }
 0x13f   : > { %v537_v8 = vsel %vm519_vm0, %v1566_v6, 0.0  ;;  %v598_v9 = vmul.f32 %v1566_v6, %v1566_v6  ;;  %v407_v12 = vpop.f32.mrb[19].mxu0  ;;  %v487_v13 = vpop.f32.mrb[19].mxu1 }
 0x140   : > { %v538_v14 = vadd.f32 %v537_v8, %v536_v3 }
 0x141   : > { %v638_v15 = vsel %vm519_vm0, %v598_v9, 0.0 }
 0x142   : > { %v639_v16 = vadd.f32 %v638_v15, %v637_v5  ;;  %v1575_v17 = vpop.f32.mrb[20].mxu0  ;;  %v1577_v18 = vpop.f32.mrb[20].mxu1 }
 0x143   : > { %v539_v21 = vsel %vm519_vm0, %v1575_v17, 0.0  ;;  %v599_v22 = vmul.f32 %v1575_v17, %v1575_v17  ;;  %v412_v23 = vpop.f32.mrb[21].mxu0  ;;  %v492_v24 = vpop.f32.mrb[21].mxu1 }
 0x144   : > { %v540_v25 = vadd.f32 %v539_v21, %v538_v14  ;;  %v605_v24 = vmul.f32 %v1487_v50, %v1487_v50 }
 0x145   : > { %v640_v26 = vsel %vm519_vm0, %v599_v22, 0.0 }
 0x146   : > { %v641_v27 = vadd.f32 %v640_v26, %v639_v16  ;;  %v1584_v30 = vpop.f32.mrb[22].mxu0  ;;  %v1586_v31 = vpop.f32.mrb[22].mxu1 }
 0x147   : > { %v541_v32 = vsel %vm519_vm0, %v1584_v30, 0.0  ;;  %v600_v33 = vmul.f32 %v1584_v30, %v1584_v30  ;;  %v417_v34 = vpop.f32.mrb[23].mxu0  ;;  %v497_v35 = vpop.f32.mrb[23].mxu1 }
 0x148   : > { %v542_v36 = vadd.f32 %v541_v32, %v540_v25  ;;  %v551_v34 = vsel %vm519_vm0, %v1487_v50, 0.0  ;;  %v606_v35 = vmul.f32 %v1493_v55, %v1493_v55 }
 0x149   : > { %v642_v39 = vsel %vm519_vm0, %v600_v33, 0.0 }
 0x14a   : > { %v643_v40 = vadd.f32 %v642_v39, %v641_v27  ;;  %v1593_v41 = vpop.f32.mrb[24].mxu0  ;;  %v1595_v42 = vpop.f32.mrb[24].mxu1 }
 0x14b   : > { %v543_v43 = vsel %vm519_vm0, %v1593_v41, 0.0  ;;  %v601_v44 = vmul.f32 %v1593_v41, %v1593_v41  ;;  %v422_v45 = vpop.f32.mrb[25].mxu0  ;;  %v502_v48 = vpop.f32.mrb[25].mxu1 }
 0x14c   : > { %v544_v51 = vadd.f32 %v543_v43, %v542_v36  ;;  %v652_v43 = vsel %vm519_vm0, %v605_v24, 0.0  ;;  %v607_v45 = vmul.f32 %v1505_v2, %v1505_v2  ;;  %v561_v24 = vsel %vm519_vm0, %v1532_v29, 0.0 }
 0x14d   : > { %v644_v52 = vsel %vm519_vm0, %v601_v44, 0.0  ;;  %v553_v44 = vsel %vm519_vm0, %v1493_v55, 0.0 }
 0x14e   : > { %v645_v53 = vadd.f32 %v644_v52, %v643_v40  ;;  %v1602_v56 = vpop.f32.mrb[26].mxu0  ;;  %v1604_v57 = vpop.f32.mrb[26].mxu1  ;;  %v654_v52 = vsel %vm519_vm0, %v606_v35, 0.0 }
 0x14f   : > { %v545_v58 = vsel %vm519_vm0, %v1602_v56, 0.0  ;;  %v602_v61 = vmul.f32 %v1602_v56, %v1602_v56  ;;  %v427_v62 = vpop.f32.mrb[27].mxu0  ;;  %v507_v63 = vpop.f32.mrb[27].mxu1 }
 0x150   : > { %v546_v0 = vadd.f32 %v545_v58, %v544_v51  ;;  %v608_v58 = vmul.f32 %v1514_v11, %v1514_v11  ;;  %v656_v63 = vsel %vm519_vm0, %v607_v45, 0.0 }
 0x151   : > { %v646_v3 = vsel %vm519_vm0, %v602_v61, 0.0 }
 0x152   : > { %v647_v4 = vadd.f32 %v646_v3, %v645_v53  ;;  %v1611_v5 = vpop.f32.mrb[28].mxu0  ;;  %v1613_v8 = vpop.f32.mrb[28].mxu1  ;;  %v555_v53 = vsel %vm519_vm0, %v1505_v2, 0.0  ;;  %v609_v3 = vmul.f32 %v1523_v20, %v1523_v20 }
 0x153   : > { %v547_v9 = vsel %vm519_vm0, %v1611_v5, 0.0  ;;  %v603_v12 = vmul.f32 %v1611_v5, %v1611_v5  ;;  %v432_v13 = vpop.f32.mrb[29].mxu0  ;;  %v512_v14 = vpop.f32.mrb[29].mxu1 }
 0x154   : > { %v548_v15 = vadd.f32 %v547_v9, %v546_v0  ;;  %v557_v0 = vsel %vm519_vm0, %v1514_v11, 0.0  ;;  %v559_v13 = vsel %vm519_vm0, %v1523_v20, 0.0  ;;  %v610_v14 = vmul.f32 %v1532_v29, %v1532_v29 }
 0x155   : > { %v648_v16 = vsel %vm519_vm0, %v603_v12, 0.0  ;;  %v658_v12 = vsel %vm519_vm0, %v608_v58, 0.0 }
 0x156   : > { %v649_v21 = vadd.f32 %v648_v16, %v647_v4  ;;  %v1620_v22 = vpop.f32.mrb[30].mxu0  ;;  %v1622_v23 = vpop.f32.mrb[30].mxu1 }
 0x157   : > { %v549_v25 = vsel %vm519_vm0, %v1620_v22, 0.0  ;;  %v604_v26 = vmul.f32 %v1620_v22, %v1620_v22  ;;  %v437_v27 = vpop.f32.mrb[31].mxu0  ;;  %v517_v32 = vpop.f32.mrb[31].mxu1 }
 0x158   : > { %v550_v33 = vadd.f32 %v549_v25, %v548_v15  ;;  %v611_v25 = vmul.f32 %v1541_v38, %v1541_v38  ;;  %v662_v32 = vsel %vm519_vm0, %v610_v14, 0.0 }
 0x159   : > { %v650_v36 = vsel %vm519_vm0, %v604_v26, 0.0 }
 0x15a   : > { %v552_v39 = vadd.f32 %v551_v34, %v550_v33  ;;  %v651_v40 = vadd.f32 %v650_v36, %v649_v21  ;;  %v660_v21 = vsel %vm519_vm0, %v609_v3, 0.0  ;;  %v563_v33 = vsel %vm519_vm0, %v1541_v38, 0.0 }
 0x15b   : > { %v612_v34 = vmul.f32 %v1550_v47, %v1550_v47 }
 0x15c   : > { %v554_v48 = vadd.f32 %v553_v44, %v552_v39  ;;  %v653_v51 = vadd.f32 %v652_v43, %v651_v40  ;;  %v664_v39 = vsel %vm519_vm0, %v611_v25, 0.0  ;;  %v565_v40 = vsel %vm519_vm0, %v1550_v47, 0.0 }
 0x15d   : > { %v613_v43 = vmul.f32 %v1559_v60, %v1559_v60 }
 0x15e   : > { %v556_v61 = vadd.f32 %v555_v53, %v554_v48  ;;  %v655_v62 = vadd.f32 %v654_v52, %v653_v51  ;;  %v666_v48 = vsel %vm519_vm0, %v612_v34, 0.0  ;;  %v567_v51 = vsel %vm519_vm0, %v1559_v60, 0.0 }
 0x15f   : > { %v614_v52 = vmul.f32 %v1568_v7, %v1568_v7 }
 0x160   : > { %v558_v4 = vadd.f32 %v557_v0, %v556_v61  ;;  %v657_v9 = vadd.f32 %v656_v63, %v655_v62  ;;  %v668_v61 = vsel %vm519_vm0, %v613_v43, 0.0  ;;  %v569_v62 = vsel %vm519_vm0, %v1568_v7, 0.0 }
 0x161   : > { %v615_v63 = vmul.f32 %v1577_v18, %v1577_v18 }
 0x162   : > { %v659_v15 = vadd.f32 %v658_v12, %v657_v9  ;;  %v560_v16 = vadd.f32 %v559_v13, %v558_v4  ;;  %v670_v4 = vsel %vm519_vm0, %v614_v52, 0.0  ;;  %v571_v9 = vsel %vm519_vm0, %v1577_v18, 0.0 }
 0x163   : > { %v616_v12 = vmul.f32 %v1586_v31, %v1586_v31 }
 0x164   : > { %v562_v26 = vadd.f32 %v561_v24, %v560_v16  ;;  %v661_v27 = vadd.f32 %v660_v21, %v659_v15  ;;  %v672_v15 = vsel %vm519_vm0, %v615_v63, 0.0  ;;  %v573_v16 = vsel %vm519_vm0, %v1586_v31, 0.0 }
 0x165   : > { %v617_v21 = vmul.f32 %v1595_v42, %v1595_v42 }
 0x166   : > { %v564_v35 = vadd.f32 %v563_v33, %v562_v26  ;;  %v663_v36 = vadd.f32 %v662_v32, %v661_v27  ;;  %v674_v26 = vsel %vm519_vm0, %v616_v12, 0.0  ;;  %v575_v27 = vsel %vm519_vm0, %v1595_v42, 0.0 }
 0x167   : > { %v618_v32 = vmul.f32 %v1604_v57, %v1604_v57 }
 0x168   : > { %v566_v44 = vadd.f32 %v565_v40, %v564_v35  ;;  %v665_v45 = vadd.f32 %v664_v39, %v663_v36  ;;  %v676_v35 = vsel %vm519_vm0, %v617_v21, 0.0  ;;  %v577_v36 = vsel %vm519_vm0, %v1604_v57, 0.0 }
 0x169   : > { %v619_v39 = vmul.f32 %v1613_v8, %v1613_v8  ;;  %v620_v40 = vmul.f32 %v1622_v23, %v1622_v23 }
 0x16a   : > { %v568_v53 = vadd.f32 %v567_v51, %v566_v44  ;;  %v667_v58 = vadd.f32 %v666_v48, %v665_v45  ;;  %v678_v45 = vsel %vm519_vm0, %v618_v32, 0.0  ;;  %v579_v48 = vsel %vm519_vm0, %v1613_v8, 0.0 }
 0x16b   : > { %v581_v51 = vsel %vm519_vm0, %v1622_v23, 0.0 }
 0x16c   : > { %v669_v0 = vadd.f32 %v668_v61, %v667_v58  ;;  %v570_v3 = vadd.f32 %v569_v62, %v568_v53  ;;  %v680_v58 = vsel %vm519_vm0, %v619_v39, 0.0  ;;  %v682_v61 = vsel %vm519_vm0, %v620_v40, 0.0 }
 0x16e   : > { %v671_v13 = vadd.f32 %v670_v4, %v669_v0  ;;  %v572_v14 = vadd.f32 %v571_v9, %v570_v3  ;;  %v690_v0 = vlaneseq }
 0x170   : > { %v673_v24 = vadd.f32 %v672_v15, %v671_v13  ;;  %v574_v25 = vadd.f32 %v573_v16, %v572_v14  ;;  %v1710_v13 = vand.u32 127, %v690_v0 }
 0x172   : > { %v675_v33 = vadd.f32 %v674_v26, %v673_v24  ;;  %v576_v34 = vadd.f32 %v575_v27, %v574_v25  ;;  %vm731_vm1 = vcmp.ge.s32.totalorder %v1710_v13, 32  ;;  %vm732_vm2 = vcmp.lt.s32.totalorder %v1710_v13, 64 }
 0x173   : > { %vm1714_vm3 = vmand %vm731_vm1, %vm732_vm2  ;;  %vm693_vm4 = vcmp.lt.s32.totalorder %v1710_v13, 32 }
 0x174   : > { %v677_v43 = vadd.f32 %v676_v35, %v675_v33  ;;  %v578_v44 = vadd.f32 %v577_v36, %v576_v34 }
 0x176   : > { %v679_v52 = vadd.f32 %v678_v45, %v677_v43  ;;  %v580_v53 = vadd.f32 %v579_v48, %v578_v44 }
 0x178   : > { %v681_v62 = vadd.f32 %v680_v58, %v679_v52  ;;  %v582_v63 = vadd.f32 %v581_v51, %v580_v53 }
 0x17a   : > { %v583_v3 = vrot.slane %v582_v63, 4  ;;  %v683_v4 = vadd.f32 %v682_v61, %v681_v62 }
 0x17c   : > { %v584_v9 = vadd.f32 %v583_v3, %v582_v63  ;;  %v684_v12 = vrot.slane %v683_v4, 4 }
 0x17e   : > { %v585_v14 = vrot.slane %v584_v9, 2  ;;  %v685_v15 = vadd.f32 %v684_v12, %v683_v4 }
 0x180   : > { %v586_v16 = vadd.f32 %v585_v14, %v584_v9  ;;  %v686_v21 = vrot.slane %v685_v15, 2 }
 0x182   : > { %v587_v24 = vrot.slane %v586_v16, 1  ;;  %v687_v25 = vadd.f32 %v686_v21, %v685_v15 }
 0x184   : > { %v588_v27 = vadd.f32 %v587_v24, %v586_v16  ;;  %v688_v32 = vrot.slane %v687_v25, 1 }
 0x186   : > { %v734_v33 = vsel %vm1714_vm3, %v588_v27, 0.0  ;;  %v695_v34 = vsel %vm693_vm4, %v588_v27, 0.0  ;;  %v689_v35 = vadd.f32 %v688_v32, %v687_v25 }
 0x187   : > { %v735_v36 = vsel %vm696_vm5, %v734_v33, 0.0  ;;  %v697_v39 = vsel %vm696_vm5, %v695_v34, 0.0 }
 0x188   : > { %736 = vadd.xlane.f32.xlu1 %v735_v36  ;;  %698 = vadd.xlane.f32.xlu0 %v697_v39  ;;  %v748_v40 = vsel %vm1714_vm3, %v689_v35, 0.0  ;;  %v710_v43 = vsel %vm693_vm4, %v689_v35, 0.0 }
 0x189   : > { %v749_v44 = vsel %vm696_vm5, %v748_v40, 0.0  ;;  %v711_v45 = vsel %vm696_vm5, %v710_v43, 0.0 }
 0x18c   : > { %750 = vadd.xlane.f32.xlu1 %v749_v44  ;;  %712 = vadd.xlane.f32.xlu0 %v711_v45 }
 0x215   : > { %v737_v48 = vpop.xlane.xlu1 %736  ;;  %v699_v51 = vpop.xlane.xlu0 %698 }
 0x216   : > { %v738_v52 = vrot.slane %v737_v48, 4  ;;  %v700_v53 = vrot.slane %v699_v51, 4 }
 0x218   : > { %v739_v58 = vadd.f32 %v738_v52, %v737_v48  ;;  %v701_v61 = vadd.f32 %v700_v53, %v699_v51 }
 0x219   : > { %v751_v62 = vpop.xlane.xlu1 %750  ;;  %v713_v63 = vpop.xlane.xlu0 %712 }
 0x21a   : > { %v740_v3 = vrot.slane %v739_v58, 2  ;;  %v702_v4 = vrot.slane %v701_v61, 2  ;;  %v752_v9 = vrot.slane %v751_v62, 4  ;;  %v714_v12 = vrot.slane %v713_v63, 4 }
 0x21c   : > { %v753_v14 = vadd.f32 %v752_v9, %v751_v62  ;;  %v715_v15 = vadd.f32 %v714_v12, %v713_v63  ;;  %v703_v16 = vadd.f32 %v702_v4, %v701_v61  ;;  %v741_v21 = vadd.f32 %v740_v3, %v739_v58  ;;  %v771_v62 = vld [vmem:[%s1981_s2] sm:$0x1] }
 0x21d   : > { %v777_v58 = vshrl.u32 %v690_v0, 7 }
 0x21e   : > { %v754_v24 = vrot.slane %v753_v14, 2  ;;  %v716_v25 = vrot.slane %v715_v15, 2  ;;  %v704_v27 = vrot.slane %v703_v16, 1  ;;  %v742_v35 = vrot.slane %v741_v21, 1 }
 0x21f   : > { %v778_v63 = vsub.s32 0, %v777_v58 }
 0x220   : > { %v755_v32 = vadd.f32 %v754_v24, %v753_v14  ;;  %v717_v33 = vadd.f32 %v716_v25, %v715_v15  ;;  %v705_v34 = vadd.f32 %v704_v27, %v703_v16  ;;  %v743_v44 = vadd.f32 %v742_v35, %v741_v21  ;;  %v773_v15 = vld [vmem:[%s1982_s3] sm:$0x1] }
 0x222   : > { %1222 = vpush %v705_v34  ;;  %v718_v36 = vrot.slane %v717_v33, 1  ;;  %v756_v39 = vrot.slane %v755_v32, 1 }
 0x224   : > { %v719_v40 = vadd.f32 %v718_v36, %v717_v33  ;;  %v757_v43 = vadd.f32 %v756_v39, %v755_v32 }
 0x226   : > { %1224 = vpush %v719_v40 }
 0x227   : > { %1226 = vpush %v743_v44 }
 0x228   : > { %1228 = vpush %v757_v43 }
 0x253   : > { %s1223_s6 = spop %1222 }
 0x254   : > { %s709_s13 = smul.f32 0.00012207031, %s1223_s6 }
 0x256   : > { %s724_s14 = smul.f32 %s709_s13, %s709_s13  ;;  %v727_v61 = vstv %s709_s13 }
 0x257   : > { %s1225_s17 = spop %1224  ;;  %v728_v9 = vsel %vm693_vm4, %v727_v61, 0.0 }
 0x258   : > { %s723_s18 = smul.f32 0.00012207031, %s1225_s17  ;;  %s1227_s19 = spop %1226 }
 0x259   : > { %s747_s20 = smul.f32 0.00012207031, %s1227_s19  ;;  %s1229_s21 = spop %1228 }
 0x25a   : > { %s725_s22 = ssub.f32 %s723_s18, %s724_s14  ;;  %s761_s23 = smul.f32 0.00012207031, %s1229_s21 }
 0x25b   : > { %s762_s24 = smul.f32 %s747_s20, %s747_s20  ;;  %v765_v3 = vstv %s747_s20 }
 0x25c   : > { %s726_s26 = smax.f32 %s1251_s25, %s725_s22  ;;  %v766_v14 = vsel %vm1714_vm3, %v765_v3, %v728_v9 }
 0x25d   : > { %v729_v45 = vstv %s726_s26  ;;  %s763_s27 = ssub.f32 %s761_s23, %s762_s24 }
 0x25e   : > { %v730_v48 = vsel %vm693_vm4, %v729_v45, 0.0 }
 0x25f   : > { %s764_s28 = smax.f32 %s1251_s25, %s763_s27 }
 0x260   : > { %v767_v51 = vstv %s764_s28 }
 0x261   : > { %v768_v52 = vsel %vm1714_vm3, %v767_v51, %v730_v48 }
 0x262   : > { %v769_v53 = vadd.f32 1e-05, %v768_v52 }
 0x264   : > { %1240 = vrsqrt.f32 %v769_v53 }
 0x26e   : > { %v1241_v4 = vpop.eup %1240 }
 0x26f   : > { %v772_v12 = vmul.f32 %v1241_v4, %v771_v62 }
 0x271   : > { %v774_v0 = vmul.f32 %v772_v12, %v766_v14  ;;  %v779_v16 = vrot.slane %v772_v12, %v778_v63 }
 0x273   : > { %v775_v21 = vsub.f32 %v773_v15, %v774_v0  ;;  %v780_v24 = vmul.f32 %v779_v16, %v1485_v49  ;;  %v781_v25 = vmul.f32 %v779_v16, %v1491_v54  ;;  %v782_v27 = vmul.f32 %v779_v16, %v1503_v1 }
 0x274   : > { %v783_v13 = vmul.f32 %v779_v16, %v1512_v10  ;;  %v784_v32 = vmul.f32 %v779_v16, %v1521_v19  ;;  %v785_v26 = vmul.f32 %v779_v16, %v1530_v28  ;;  %v786_v33 = vmul.f32 %v779_v16, %v1539_v37 }
 0x275   : > { %v787_v34 = vmul.f32 %v779_v16, %v1548_v46  ;;  %v788_v35 = vmul.f32 %v779_v16, %v1557_v59  ;;  %v789_v36 = vmul.f32 %v779_v16, %v1566_v6  ;;  %v790_v49 = vmul.f32 %v779_v16, %v1575_v17 }
 0x276   : > { %v791_v54 = vmul.f32 %v779_v16, %v1584_v30  ;;  %v792_v1 = vmul.f32 %v779_v16, %v1593_v41  ;;  %v793_v10 = vmul.f32 %v779_v16, %v1602_v56  ;;  %v794_v19 = vmul.f32 %v779_v16, %v1611_v5 }
 0x277   : > { %v795_v28 = vmul.f32 %v779_v16, %v1620_v22  ;;  %v796_v37 = vmul.f32 %v779_v16, %v1487_v50  ;;  %v797_v46 = vmul.f32 %v779_v16, %v1493_v55  ;;  %v798_v59 = vmul.f32 %v779_v16, %v1505_v2 }
 0x278   : > { %v799_v6 = vmul.f32 %v779_v16, %v1514_v11  ;;  %v800_v17 = vmul.f32 %v779_v16, %v1523_v20  ;;  %v801_v30 = vmul.f32 %v779_v16, %v1532_v29  ;;  %v802_v41 = vmul.f32 %v779_v16, %v1541_v38 }
 0x279   : > { %v803_v56 = vmul.f32 %v779_v16, %v1550_v47  ;;  %v804_v5 = vmul.f32 %v779_v16, %v1559_v60  ;;  %v805_v22 = vmul.f32 %v779_v16, %v1568_v7  ;;  %v806_v50 = vmul.f32 %v779_v16, %v1577_v18 }
 0x27a   : > { %v807_v55 = vmul.f32 %v779_v16, %v1586_v31  ;;  %v808_v2 = vmul.f32 %v779_v16, %v1595_v42  ;;  %v809_v11 = vmul.f32 %v779_v16, %v1604_v57  ;;  %v810_v20 = vmul.f32 %v779_v16, %v1613_v8 }
 0x27b   : > { %v811_v29 = vmul.f32 %v779_v16, %v1622_v23  ;;  %v816_v39 = vrot.slane %v775_v21, %v778_v63 }
 0x27d   : > { %v1774_v38 = vadd.f32 %v816_v39, %v780_v24  ;;  %v1776_v47 = vadd.f32 %v816_v39, %v781_v25  ;;  %v1778_v60 = vadd.f32 %v816_v39, %v782_v27  ;;  %v1780_v7 = vadd.f32 %v816_v39, %v783_v13 }
 0x27e   : > { %v1782_v18 = vadd.f32 %v816_v39, %v784_v32  ;;  %v1784_v31 = vadd.f32 %v816_v39, %v785_v26  ;;  %v1786_v42 = vadd.f32 %v816_v39, %v786_v33  ;;  %v1788_v57 = vadd.f32 %v816_v39, %v787_v34 }
 0x27f   : > { %v826_v8 = vadd.f32 %v816_v39, %v788_v35  ;;  %v827_v40 = vadd.f32 %v816_v39, %v789_v36  ;;  %v1790_v23 = vadd.f32 %v816_v39, %v790_v49  ;;  %v1792_v43 = vadd.f32 %v816_v39, %v791_v54 }
 0x280   : > { %v830_v44 = vadd.f32 %v816_v39, %v792_v1  ;;  %v831_v45 = vadd.f32 %v816_v39, %v793_v10  ;;  %v1794_v48 = vadd.f32 %v816_v39, %v794_v19  ;;  %v1796_v51 = vadd.f32 %v816_v39, %v795_v28 }
 0x281   : > { %v1798_v52 = vadd.f32 %v816_v39, %v796_v37  ;;  %v1800_v53 = vadd.f32 %v816_v39, %v797_v46  ;;  %v1802_v58 = vadd.f32 %v816_v39, %v798_v59  ;;  %v1804_v61 = vadd.f32 %v816_v39, %v799_v6 }
 0x282   : > { %v1806_v62 = vadd.f32 %v816_v39, %v800_v17  ;;  %v1808_v63 = vadd.f32 %v816_v39, %v801_v30  ;;  %v1810_v3 = vadd.f32 %v816_v39, %v802_v41  ;;  %v1812_v4 = vadd.f32 %v816_v39, %v803_v56 }
 0x283   : > { %v1814_v9 = vadd.f32 %v816_v39, %v804_v5  ;;  %v1816_v12 = vadd.f32 %v816_v39, %v805_v22  ;;  %v1818_v14 = vadd.f32 %v816_v39, %v806_v50  ;;  %v1820_v15 = vadd.f32 %v816_v39, %v807_v55 }
 0x284   : > { %v1822_v0 = vadd.f32 %v816_v39, %v808_v2  ;;  %v1824_v16 = vadd.f32 %v816_v39, %v809_v11  ;;  %v1826_v21 = vadd.f32 %v816_v39, %v810_v20  ;;  %v1828_v24 = vadd.f32 %v816_v39, %v811_v29 }
 0x285   : > { %v850_v25 = vmax.f32 %v1774_v38, 0.0  ;;  %v851_v27 = vmax.f32 %v1776_v47, 0.0  ;;  %v852_v13 = vmax.f32 %v1778_v60, 0.0  ;;  %v853_v32 = vmax.f32 %v1780_v7, 0.0 }
 0x286   : > { %v854_v26 = vmax.f32 %v1782_v18, 0.0  ;;  %v855_v33 = vmax.f32 %v1784_v31, 0.0  ;;  %v856_v34 = vmax.f32 %v1786_v42, 0.0  ;;  %v857_v35 = vmax.f32 %v1788_v57, 0.0 }
 0x287   : > { %v858_v36 = vmax.f32 %v826_v8, 0.0  ;;  %v859_v49 = vmax.f32 %v827_v40, 0.0  ;;  %v860_v54 = vmax.f32 %v1790_v23, 0.0  ;;  %v861_v1 = vmax.f32 %v1792_v43, 0.0 }
 0x288   : > { %v862_v10 = vmax.f32 %v830_v44, 0.0  ;;  %v863_v19 = vmax.f32 %v831_v45, 0.0  ;;  %v864_v28 = vmax.f32 %v1794_v48, 0.0  ;;  %v865_v37 = vmax.f32 %v1796_v51, 0.0 }
 0x289   : > { %v866_v46 = vmax.f32 %v1798_v52, 0.0  ;;  %v867_v59 = vmax.f32 %v1800_v53, 0.0  ;;  %v868_v6 = vmax.f32 %v1802_v58, 0.0  ;;  %v869_v17 = vmax.f32 %v1804_v61, 0.0 }
 0x28a   : > { %v870_v30 = vmax.f32 %v1806_v62, 0.0  ;;  %v871_v41 = vmax.f32 %v1808_v63, 0.0  ;;  %v872_v56 = vmax.f32 %v1810_v3, 0.0  ;;  %v873_v5 = vmax.f32 %v1812_v4, 0.0 }
 0x28b   : > { %v874_v22 = vmax.f32 %v1814_v9, 0.0  ;;  %v875_v50 = vmax.f32 %v1816_v12, 0.0  ;;  %v876_v55 = vmax.f32 %v1818_v14, 0.0  ;;  %v877_v2 = vmax.f32 %v1820_v15, 0.0 }
 0x28c   : > { %v879_v20 = vmax.f32 %v1824_v16, 0.0  ;;  %v882_v29 = vmax.f32 %v850_v25, %v852_v13  ;;  %v883_v39 = vmax.f32 %v851_v27, %v853_v32  ;;  %v904_v38 = vmax.f32 %v852_v13, %v854_v26 }
 0x28d   : > { %v905_v47 = vmax.f32 %v853_v32, %v855_v33  ;;  %v926_v60 = vmax.f32 %v856_v34, %v858_v36  ;;  %v927_v7 = vmax.f32 %v857_v35, %v859_v49  ;;  %v948_v18 = vmax.f32 %v860_v54, %v862_v10 }
 0x28e   : > { %v949_v31 = vmax.f32 %v861_v1, %v863_v19  ;;  %v887_v42 = vrot.slane %v882_v29, 7  ;;  %v888_v57 = vrot.slane %v883_v39, 7  ;;  %v894_v8 = vrot.slane %v882_v29, 1 }
 0x28f   : > { %v895_v40 = vrot.slane %v883_v39, 1  ;;  %v906_v23 = vmax.f32 %v904_v38, %v856_v34  ;;  %v907_v43 = vmax.f32 %v905_v47, %v857_v35  ;;  %v928_v44 = vmax.f32 %v926_v60, %v860_v54 }
 0x290   : > { %v929_v45 = vmax.f32 %v927_v7, %v861_v1  ;;  %v889_v11 = vsel %vm886_vm6, %v887_v42, %v888_v57  ;;  %v892_v25 = vsel %vm886_vm6, 0.0, %v887_v42  ;;  %v992_v51 = vmax.f32 %v868_v6, %v870_v30 }
 0x291   : > { %v896_v27 = vsel %vm893_vm7, %v894_v8, %v895_v40  ;;  %v899_v13 = vsel %vm893_vm7, %v895_v40, 0.0  ;;  %v900_v32 = vmax.f32 %v892_v25, %v882_v29  ;;  %v901_v26 = vmax.f32 %v889_v11, %v883_v39 }
 0x292   : > { %v910_v33 = vrot.slane %v906_v23, 7  ;;  %v911_v36 = vrot.slane %v907_v43, 7  ;;  %v916_v34 = vrot.slane %v906_v23, 1  ;;  %v917_v35 = vrot.slane %v907_v43, 1 }
 0x293   : > { %v932_v49 = vrot.slane %v928_v44, 7  ;;  %v933_v54 = vrot.slane %v929_v45, 7  ;;  %v902_v1 = vmax.f32 %v900_v32, %v896_v27  ;;  %v903_v10 = vmax.f32 %v901_v26, %v899_v13 }
 0x294   : > { %v912_v19 = vsel %vm886_vm6, %v910_v33, %v911_v36  ;;  %v915_v29 = vsel %vm886_vm6, 0.0, %v910_v33  ;;  %v918_v11 = vsel %vm893_vm7, %v916_v34, %v917_v35  ;;  %v921_v39 = vsel %vm893_vm7, %v917_v35, 0.0 }
 0x295   : > { %v922_v38 = vmax.f32 %v915_v29, %v906_v23  ;;  %v923_v47 = vmax.f32 %v912_v19, %v907_v43  ;;  %v934_v60 = vsel %vm886_vm6, %v932_v49, %v933_v54  ;;  %v937_v7 = vsel %vm886_vm6, 0.0, %v932_v49  ;;  %1058 = vst.msk [vmem:[%s1864_s16] sm:$0xff] %vm519_vm0, %v902_v1  ;;  %1059 = vst.msk [vmem:[%s1864_s16 + $0x8] sm:$0xff] %vm519_vm0, %v903_v10 }
 0x296   : > { %v938_v42 = vrot.slane %v928_v44, 1  ;;  %v939_v57 = vrot.slane %v929_v45, 1  ;;  %v944_v25 = vmax.f32 %v937_v7, %v928_v44  ;;  %v945_v27 = vmax.f32 %v934_v60, %v929_v45 }
 0x297   : > { %v924_v8 = vmax.f32 %v922_v38, %v918_v11  ;;  %v925_v40 = vmax.f32 %v923_v47, %v921_v39  ;;  %v950_v43 = vmax.f32 %v948_v18, %v864_v28  ;;  %v951_v32 = vmax.f32 %v949_v31, %v865_v37 }
 0x298   : > { %v940_v13 = vsel %vm893_vm7, %v938_v42, %v939_v57  ;;  %v943_v23 = vsel %vm893_vm7, %v939_v57, 0.0  ;;  %v970_v44 = vmax.f32 %v864_v28, %v866_v46  ;;  %v971_v45 = vmax.f32 %v865_v37, %v867_v59 }
 0x299   : > { %v946_v26 = vmax.f32 %v944_v25, %v940_v13  ;;  %v947_v33 = vmax.f32 %v945_v27, %v943_v23  ;;  %1060 = vst.msk [vmem:[%s1864_s16 + $0x10] sm:$0xff] %vm519_vm0, %v924_v8  ;;  %1061 = vst.msk [vmem:[%s1864_s16 + $0x18] sm:$0xff] %vm519_vm0, %v925_v40  ;;  %v954_v18 = vrot.slane %v950_v43, 7  ;;  %v955_v36 = vrot.slane %v951_v32, 7 }
 0x29a   : > { %v960_v31 = vrot.slane %v950_v43, 1  ;;  %v961_v34 = vrot.slane %v951_v32, 1  ;;  %v972_v35 = vmax.f32 %v970_v44, %v868_v6  ;;  %v973_v48 = vmax.f32 %v971_v45, %v869_v17 }
 0x29b   : > { %v993_v52 = vmax.f32 %v869_v17, %v871_v41  ;;  %1062 = vst.msk [vmem:[%s1864_s16 + $0x20] sm:$0xff] %vm519_vm0, %v946_v26  ;;  %1063 = vst.msk [vmem:[%s1864_s16 + $0x28] sm:$0xff] %vm519_vm0, %v947_v33  ;;  %v956_v53 = vsel %vm886_vm6, %v954_v18, %v955_v36  ;;  %v959_v28 = vsel %vm886_vm6, 0.0, %v954_v18  ;;  %v994_v17 = vmax.f32 %v992_v51, %v872_v56 }
 0x29c   : > { %v962_v37 = vsel %vm893_vm7, %v960_v31, %v961_v34  ;;  %v965_v62 = vsel %vm893_vm7, %v961_v34, 0.0  ;;  %v966_v46 = vmax.f32 %v959_v28, %v950_v43  ;;  %v967_v58 = vmax.f32 %v956_v53, %v951_v32 }
 0x29d   : > { %v976_v59 = vrot.slane %v972_v35, 7  ;;  %v977_v6 = vrot.slane %v973_v48, 7  ;;  %v982_v63 = vrot.slane %v972_v35, 1  ;;  %v983_v61 = vrot.slane %v973_v48, 1 }
 0x29e   : > { %v995_v30 = vmax.f32 %v993_v52, %v873_v5  ;;  %v968_v41 = vmax.f32 %v966_v46, %v962_v37  ;;  %v969_v49 = vmax.f32 %v967_v58, %v965_v62  ;;  %v998_v39 = vrot.slane %v994_v17, 7 }
 0x29f   : > { %v978_v54 = vsel %vm886_vm6, %v976_v59, %v977_v6  ;;  %v981_v1 = vsel %vm886_vm6, 0.0, %v976_v59  ;;  %v984_v10 = vsel %vm893_vm7, %v982_v63, %v983_v61  ;;  %v987_v19 = vsel %vm893_vm7, %v983_v61, 0.0 }
 0x2a0   : > { %v988_v29 = vmax.f32 %v981_v1, %v972_v35  ;;  %v989_v11 = vmax.f32 %v978_v54, %v973_v48  ;;  %v999_v38 = vrot.slane %v995_v30, 7  ;;  %v1004_v47 = vrot.slane %v994_v17, 1  ;;  %1064 = vst.msk [vmem:[%s1864_s16 + $0x30] sm:$0xff] %vm519_vm0, %v968_v41  ;;  %1065 = vst.msk [vmem:[%s1864_s16 + $0x38] sm:$0xff] %vm519_vm0, %v969_v49 }
 0x2a1   : > { %v1005_v60 = vrot.slane %v995_v30, 1  ;;  %v1014_v57 = vmax.f32 %v872_v56, %v874_v22  ;;  %v1015_v8 = vmax.f32 %v873_v5, %v875_v50  ;;  %v880_v40 = vmax.f32 %v1826_v21, 0.0 }
 0x2a2   : > { %v990_v7 = vmax.f32 %v988_v29, %v984_v10  ;;  %v991_v42 = vmax.f32 %v989_v11, %v987_v19  ;;  %v1000_v25 = vsel %vm886_vm6, %v998_v39, %v999_v38  ;;  %v1003_v27 = vsel %vm886_vm6, 0.0, %v998_v39 }
 0x2a3   : > { %v1006_v13 = vsel %vm893_vm7, %v1004_v47, %v1005_v60  ;;  %v1010_v23 = vmax.f32 %v1003_v27, %v994_v17  ;;  %v1011_v43 = vmax.f32 %v1000_v25, %v995_v30  ;;  %v1016_v9 = vmax.f32 %v1014_v57, %v876_v55 }
 0x2a4   : > { %v1017_v3 = vmax.f32 %v1015_v8, %v877_v2  ;;  %1066 = vst.msk [vmem:[%s1864_s16 + $0x40] sm:$0xff] %vm519_vm0, %v990_v7  ;;  %1067 = vst.msk [vmem:[%s1864_s16 + $0x48] sm:$0xff] %vm519_vm0, %v991_v42  ;;  %v881_v4 = vmax.f32 %v1828_v24, 0.0  ;;  %v1009_v12 = vsel %vm893_vm7, %v1005_v60, 0.0  ;;  %v1986_v21 = vmax.f32 %v1822_v0, 0.0 }
 0x2a5   : > { %v1037_v5 = vmax.f32 %v877_v2, %v879_v20  ;;  %v1012_v22 = vmax.f32 %v1010_v23, %v1006_v13  ;;  %v1013_v50 = vmax.f32 %v1011_v43, %v1009_v12  ;;  %v1020_v32 = vrot.slane %v1016_v9, 7 }
 0x2a6   : > { %v1036_v56 = vmax.f32 %v876_v55, %v1986_v21  ;;  %v1021_v26 = vrot.slane %v1017_v3, 7  ;;  %v1026_v33 = vrot.slane %v1016_v9, 1  ;;  %v1027_v44 = vrot.slane %v1017_v3, 1 }
 0x2a7   : > { %v1039_v24 = vmax.f32 %v1037_v5, %v881_v4  ;;  %v1025_v0 = vsel %vm886_vm6, 0.0, %v1020_v32  ;;  %1068 = vst.msk [vmem:[%s1864_s16 + $0x50] sm:$0xff] %vm519_vm0, %v1012_v22  ;;  %1069 = vst.msk [vmem:[%s1864_s16 + $0x58] sm:$0xff] %vm519_vm0, %v1013_v50 }
 0x2a8   : > { %v1038_v45 = vmax.f32 %v1036_v56, %v880_v40  ;;  %v1022_v18 = vsel %vm886_vm6, %v1020_v32, %v1021_v26  ;;  %v1028_v14 = vsel %vm893_vm7, %v1026_v33, %v1027_v44  ;;  %v1031_v15 = vsel %vm893_vm7, %v1027_v44, 0.0 }
 0x2a9   : > { %v1032_v16 = vmax.f32 %v1025_v0, %v1016_v9  ;;  %v1033_v55 = vmax.f32 %v1022_v18, %v1017_v3  ;;  %v1043_v20 = vrot.slane %v1039_v24, 7  ;;  %v1049_v31 = vrot.slane %v1039_v24, 1 }
 0x2aa   : > { %v1042_v2 = vrot.slane %v1038_v45, 7  ;;  %v1048_v36 = vrot.slane %v1038_v45, 1 }
 0x2ab   : > { %v1034_v34 = vmax.f32 %v1032_v16, %v1028_v14  ;;  %v1035_v35 = vmax.f32 %v1033_v55, %v1031_v15  ;;  %v1053_v37 = vsel %vm893_vm7, %v1049_v31, 0.0 }
 0x2ac   : > { %v1044_v48 = vsel %vm886_vm6, %v1042_v2, %v1043_v20  ;;  %v1047_v51 = vsel %vm886_vm6, 0.0, %v1042_v2  ;;  %v1050_v52 = vsel %vm893_vm7, %v1048_v36, %v1049_v31 }
 0x2ad   : > { %v1054_v53 = vmax.f32 %v1047_v51, %v1038_v45  ;;  %v1055_v28 = vmax.f32 %v1044_v48, %v1039_v24  ;;  %1070 = vst.msk [vmem:[%s1864_s16 + $0x60] sm:$0xff] %vm519_vm0, %v1034_v34  ;;  %1071 = vst.msk [vmem:[%s1864_s16 + $0x68] sm:$0xff] %vm519_vm0, %v1035_v35 }
 0x2af   : > { %v1056_v62 = vmax.f32 %v1054_v53, %v1050_v52  ;;  %v1057_v46 = vmax.f32 %v1055_v28, %v1053_v37 }
 0x2b1   : > { %1072 = vst.msk [vmem:[%s1864_s16 + $0x70] sm:$0xff] %vm519_vm0, %v1056_v62  ;;  %1073 = vst.msk [vmem:[%s1864_s16 + $0x78] sm:$0xff] %vm519_vm0, %v1057_v46 }
 0x2b2 PF: > { %s14_s15 = sadd.s32 1, %s1248_s15  }
 0x2b3   : > { %p11_p4 = scmp.ge.s32.totalorder %s14_s15, 4  }
 0x2b5   :  { %13 = sbr.rel (!%p11_p4) target bundleno = 1 (0x1), region = 66 }

</bundles_post_ra>
